<compile_context>
chip_gen: v7x
topology: tpu7x:2x2x1
jax: 0.10.0
libtpu: 0.0.40
codegen_flags: <defaults>
</compile_context>

<pallas_src>
import functools
from math import ceil

import numpy as np
import jax
import jax.numpy as jnp
from jax.experimental import pallas as pl


# ----------------------------- Pallas kernels -------------------------------

def fused_layer_kernel(b_ref, inv_ref, x_ref, wr_ref, ws_ref, bb_ref, p_ref,
                       o_ref, pooled_ref):
    """relu(GraphConv_mean(x)) fused with the global_mean_pool readout."""
    # mean aggregation: (B @ x) * inv_deg -- single adjacency + a VPU multiply
    # that rides in a VALU slot while the MXU is busy.
    agg = jnp.dot(b_ref[...], x_ref[...], preferred_element_type=jnp.float32)
    agg = agg * inv_ref[...]
    out = (jnp.dot(agg, wr_ref[...], preferred_element_type=jnp.float32)
           + jnp.dot(x_ref[...], ws_ref[...], preferred_element_type=jnp.float32)
           + bb_ref[...])
    out = jnp.maximum(out, 0.0)
    o_ref[...] = out
    # global_mean_pool readout computed on the VMEM-resident `out`.
    pooled_ref[...] = jnp.dot(p_ref[...], out, preferred_element_type=jnp.float32)


def fused_layer_pool_kernel(b_ref, inv_ref, x_ref, wr_ref, ws_ref, bb_ref,
                            p_ref, pwr_ref, pws_ref, pb_ref,
                            xsc_ref, pooled_ref, score_ref):
    """Conv layer + readout + SAGPooling score + tanh scaling in one kernel."""
    agg = jnp.dot(b_ref[...], x_ref[...], preferred_element_type=jnp.float32)
    agg = agg * inv_ref[...]
    out = (jnp.dot(agg, wr_ref[...], preferred_element_type=jnp.float32)
           + jnp.dot(x_ref[...], ws_ref[...], preferred_element_type=jnp.float32)
           + bb_ref[...])
    out = jnp.maximum(out, 0.0)
    pooled_ref[...] = jnp.dot(p_ref[...], out, preferred_element_type=jnp.float32)
    # SAGPooling internal GraphConv(hidden, 1), aggr='add'.  Reassociated as
    # B @ (out @ w_rel): the N x N matmul contracts over 1 column, not hidden.
    xr = jnp.dot(out, pwr_ref[...], preferred_element_type=jnp.float32)    # (N, 1)
    score = (jnp.dot(b_ref[...], xr, preferred_element_type=jnp.float32)
             + jnp.dot(out, pws_ref[...], preferred_element_type=jnp.float32)
             + pb_ref[...])
    # x[perm] * tanh(score[perm]) == (x * tanh(score))[perm]: scale here,
    # only the gather-by-perm (data dependent) happens outside.
    xsc_ref[...] = out * jnp.tanh(score)
    score_ref[...] = score


def mlp_head_kernel(*refs, n_parts):
    """relu(lin1(JK-concat)) -> dropout(eval) -> lin2 -> log_softmax.

    lin1 over the JumpingKnowledge concat is computed as a sum of per-layer
    dots (pooled_l @ w1_l), so the concat never materializes in HBM.
    """
    pooled = refs[:n_parts]
    w1s = refs[n_parts:2 * n_parts]
    b1_ref, w2_ref, b2_ref, o_ref = refs[2 * n_parts:]
    acc = jnp.dot(pooled[0][...], w1s[0][...], preferred_element_type=jnp.float32)
    for p, w in zip(pooled[1:], w1s[1:]):
        acc = acc + jnp.dot(p[...], w[...], preferred_element_type=jnp.float32)
    h = jnp.maximum(acc + b1_ref[...], 0.0)
    # TODO(synk): F.dropout(p=0.5, training=...) implemented in eval mode
    # (identity); training-mode dropout would use pltpu.prng_random_bits.
    logits = jnp.dot(h, w2_ref[...], preferred_element_type=jnp.float32) + b2_ref[...]
    m = jnp.max(logits, axis=-1, keepdims=True)
    z = logits - m
    lse = jnp.log(jnp.sum(jnp.exp(z), axis=-1, keepdims=True))
    o_ref[...] = z - lse


# ----------------------------- pallas_call glue ------------------------------

def _full_spec(shape):
    zeros = (0,) * len(shape)
    return pl.BlockSpec(shape, lambda *_: zeros)


def _pcall(kernel, out_shapes, *args):
    # Small graphs: whole problem fits VMEM, grid=().
    # TODO(synk): for large N, tile adjacency rows into (tm, N) blocks with a
    # reduction grid axis + VMEM f32 accumulator,
    # dimension_semantics=('parallel','arbitrary'), cast the adjacency to bf16
    # (int8 only on v5e/v6e, never v7x), and budget tiles for v7x's 64 MiB VMEM.
    multi = isinstance(out_shapes[0], (tuple, list))
    shapes = tuple(out_shapes) if multi else (tuple(out_shapes),)
    out_shape = tuple(jax.ShapeDtypeStruct(tuple(s), jnp.float32) for s in shapes)
    out_specs = tuple(_full_spec(tuple(s)) for s in shapes)
    if not multi:
        out_shape, out_specs = out_shape[0], out_specs[0]
    return pl.pallas_call(
        kernel,
        out_shape=out_shape,
        in_specs=[_full_spec(a.shape) for a in args],
        out_specs=out_specs,
    )(*args)


def fused_layer(B, inv_deg, x, P, wr, ws, b):
    N, H, G = x.shape[0], wr.shape[1], P.shape[0]
    return _pcall(fused_layer_kernel, ((N, H), (G, H)),
                  B, inv_deg, x, wr, ws, b, P)


def fused_layer_pool(B, inv_deg, x, P, wr, ws, b, pwr, pws, pb):
    N, H, G = x.shape[0], wr.shape[1], P.shape[0]
    return _pcall(fused_layer_pool_kernel, ((N, H), (G, H), (N, 1)),
                  B, inv_deg, x, wr, ws, b, P, pwr, pws, pb)


def mlp_head(pooled_list, w1, b1, w2, b2):
    L = len(pooled_list)
    G, H = pooled_list[0].shape
    C = w2.shape[1]
    w1_parts = [w1[l * H:(l + 1) * H, :] for l in range(L)]   # static slices
    kern = functools.partial(mlp_head_kernel, n_parts=L)
    return _pcall(kern, (G, C), *pooled_list, *w1_parts, b1, w2, b2)


# --------------------------- graph structure glue ----------------------------

def build_ring_adjacency(graph_sizes):
    """Binary adjacency B[i, j] = 1 iff edge j -> i (undirected rings)."""
    n_total = sum(graph_sizes)
    B = np.zeros((n_total, n_total), np.float32)
    off = 0
    for n in graph_sizes:
        for i in range(n):
            j = (i + 1) % n
            B[off + j, off + i] = 1.0
            B[off + i, off + j] = 1.0
        off += n
    return B


def pool_matrix_static(sizes):
    """global_mean_pool matrix (num_graphs, N); sizes are static ints."""
    n = sum(sizes)
    P = np.zeros((len(sizes), n), np.float32)
    off = 0
    for g, s in enumerate(sizes):
        P[g, off:off + s] = 1.0 / s
        off += s
    return jnp.asarray(P)


def device_topk_perm(score, sizes, ratio):
    """Per-graph top-ceil(ratio*n) node selection entirely on device.

    `sizes`/`ratio` are static, so the selected count per graph (and every
    output shape) is static; only *which* nodes survive is data-dependent.
    """
    G = len(sizes)
    offsets = np.cumsum([0] + list(sizes))[:-1]
    maxn = max(sizes)
    pad_idx = np.zeros((G, maxn), np.int32)
    mask = np.zeros((G, maxn), bool)
    for g, s in enumerate(sizes):
        pad_idx[g, :s] = offsets[g] + np.arange(s)
        mask[g, :s] = True
    padded = jnp.where(jnp.asarray(mask),
                       jnp.take(score, jnp.asarray(pad_idx)),
                       -jnp.inf)
    ks = [int(ceil(ratio * s)) for s in sizes]
    _, idx = jax.lax.top_k(padded, max(ks))          # (G, kmax), descending
    perm = jnp.concatenate(
        [idx[g, :ks[g]] + int(offsets[g]) for g in range(G)])
    return perm, ks


# ------------------------------- parameters ----------------------------------

def init_params(key, num_features, hidden, num_layers, num_classes):
    keys = iter(jax.random.split(key, 32))

    def lin(fin, fout, bias=True, scale=0.1):
        w = jax.random.normal(next(keys), (fin, fout), jnp.float32) * scale
        b = (jax.random.normal(next(keys), (1, fout), jnp.float32) * scale
             if bias else None)
        return w, b

    def gconv(fin, fout):
        w_rel, b = lin(fin, fout)
        w_root, _ = lin(fin, fout, bias=False)
        return (w_rel, w_root, b)

    return {
        "conv1": gconv(num_features, hidden),
        "convs": [gconv(hidden, hidden) for _ in range(num_layers - 1)],
        # SAGPooling's internal GNN is GraphConv(hidden, 1) (default aggr='add')
        "pools": [gconv(hidden, 1) for _ in range(num_layers // 2)],
        "lin1": lin(num_layers * hidden, hidden),
        "lin2": lin(hidden, num_classes),
    }


# --------------------------------- forward -----------------------------------

def net_forward(params, x, B, *, graph_sizes, ratio):
    sizes = list(graph_sizes)
    P = pool_matrix_static(sizes)
    deg = jnp.sum(B, axis=1, keepdims=True)
    inv_deg = 1.0 / jnp.maximum(deg, 1.0)

    wr, ws, b = params["conv1"]
    x, pooled = fused_layer(B, inv_deg, x, P, wr, ws, b)    # relu(conv1)+readout
    xs = [pooled]

    num_convs = len(params["convs"])
    for i, (wr, ws, b) in enumerate(params["convs"]):
        do_pool = (i % 2 == 0) and (i < num_convs - 1)
        if do_pool:
            pwr, pws, pb = params["pools"][i // 2]
            x_scaled, pooled, score = fused_layer_pool(
                B, inv_deg, x, P, wr, ws, b, pwr, pws, pb)
            xs.append(pooled)
            # ---- SAGPooling: top-k + graph re-slicing, all on device ----
            perm, sizes = device_topk_perm(score[:, 0], sizes, ratio)
            x = jnp.take(x_scaled, perm, axis=0)
            B = jnp.take(jnp.take(B, perm, axis=0), perm, axis=1)
            deg = jnp.sum(B, axis=1, keepdims=True)
            inv_deg = 1.0 / jnp.maximum(deg, 1.0)
            P = pool_matrix_static(sizes)
        else:
            x, pooled = fused_layer(B, inv_deg, x, P, wr, ws, b)
            xs.append(pooled)

    w1, b1 = params["lin1"]
    w2, b2 = params["lin2"]
    # JumpingKnowledge(mode='cat') is folded into lin1 inside mlp_head_kernel.
    return mlp_head(xs, w1, b1, w2, b2)


# ----------------------------------- main -------------------------------------

if __name__ == "__main__":
    num_features, hidden, num_layers, num_classes, ratio = 16, 32, 4, 6, 0.8
    graph_sizes = (10, 12, 10)
    num_graphs = len(graph_sizes)
    n_nodes = sum(graph_sizes)

    B = jnp.asarray(build_ring_adjacency(graph_sizes))

    key = jax.random.PRNGKey(0)
    kx, kp = jax.random.split(key)
    x = jax.random.normal(kx, (n_nodes, num_features), jnp.float32)
    params = init_params(kp, num_features, hidden, num_layers, num_classes)

    fwd = jax.jit(functools.partial(net_forward,
                                    graph_sizes=graph_sizes, ratio=ratio))
    out = fwd(params, x, B)
    out = jax.block_until_ready(out)

    assert out.shape == (num_graphs, num_classes)
    # rows of log_softmax must exponentiate-sum to 1
    assert np.allclose(np.exp(np.asarray(out)).sum(axis=-1), 1.0, atol=1e-4)
    print("KERNEL_OK")
</pallas_src>

<mosaic_0001>
module attributes {stable_mosaic.version = 11 : i64} {
  func.func @fused_layer_pool_kernel(%arg0: memref<32x32xf32, #tpu.memory_space<vmem>>, %arg1: memref<32x1xf32, #tpu.memory_space<vmem>>, %arg2: memref<32x32xf32, #tpu.memory_space<vmem>>, %arg3: memref<32x32xf32, #tpu.memory_space<vmem>>, %arg4: memref<32x32xf32, #tpu.memory_space<vmem>>, %arg5: memref<1x32xf32, #tpu.memory_space<vmem>>, %arg6: memref<3x32xf32, #tpu.memory_space<vmem>>, %arg7: memref<32x1xf32, #tpu.memory_space<vmem>>, %arg8: memref<32x1xf32, #tpu.memory_space<vmem>>, %arg9: memref<1x1xf32, #tpu.memory_space<vmem>>, %arg10: memref<32x32xf32, #tpu.memory_space<vmem>>, %arg11: memref<3x32xf32, #tpu.memory_space<vmem>>, %arg12: memref<32x1xf32, #tpu.memory_space<vmem>>) attributes {dimension_semantics = [], scalar_prefetch = 0 : i64, scratch_operands = 0 : i64, tpu.core_type = #tpu.core_type<tc>} {
    %c0 = arith.constant 0 : index
    %c0_0 = arith.constant 0 : index
    %0 = vector.load %arg0[%c0, %c0_0] : memref<32x32xf32, #tpu.memory_space<vmem>>, vector<32x32xf32>
    %c0_1 = arith.constant 0 : index
    %c0_2 = arith.constant 0 : index
    %1 = vector.load %arg2[%c0_1, %c0_2] : memref<32x32xf32, #tpu.memory_space<vmem>>, vector<32x32xf32>
    %cst = arith.constant dense<0.000000e+00> : vector<32x32xf32>
    %2 = tpu.matmul %0, %1, %cst {dimension_numbers = #tpu.dot_dimension_numbers<[1], [0], [0], [1], [0, 0, 1, 1], [], []>} : vector<32x32xf32>, vector<32x32xf32>, vector<32x32xf32> -> vector<32x32xf32>
    %c0_3 = arith.constant 0 : index
    %c0_4 = arith.constant 0 : index
    %3 = vector.load %arg1[%c0_3, %c0_4] : memref<32x1xf32, #tpu.memory_space<vmem>>, vector<32x1xf32>
    %4 = vector.broadcast %3 : vector<32x1xf32> to vector<32x32xf32>
    %5 = arith.mulf %2, %4 : vector<32x32xf32>
    %c0_5 = arith.constant 0 : index
    %c0_6 = arith.constant 0 : index
    %6 = vector.load %arg3[%c0_5, %c0_6] : memref<32x32xf32, #tpu.memory_space<vmem>>, vector<32x32xf32>
    %cst_7 = arith.constant dense<0.000000e+00> : vector<32x32xf32>
    %7 = tpu.matmul %5, %6, %cst_7 {dimension_numbers = #tpu.dot_dimension_numbers<[1], [0], [0], [1], [0, 0, 1, 1], [], []>} : vector<32x32xf32>, vector<32x32xf32>, vector<32x32xf32> -> vector<32x32xf32>
    %c0_8 = arith.constant 0 : index
    %c0_9 = arith.constant 0 : index
    %8 = vector.load %arg2[%c0_8, %c0_9] : memref<32x32xf32, #tpu.memory_space<vmem>>, vector<32x32xf32>
    %c0_10 = arith.constant 0 : index
    %c0_11 = arith.constant 0 : index
    %9 = vector.load %arg4[%c0_10, %c0_11] : memref<32x32xf32, #tpu.memory_space<vmem>>, vector<32x32xf32>
    %cst_12 = arith.constant dense<0.000000e+00> : vector<32x32xf32>
    %10 = tpu.matmul %8, %9, %cst_12 {dimension_numbers = #tpu.dot_dimension_numbers<[1], [0], [0], [1], [0, 0, 1, 1], [], []>} : vector<32x32xf32>, vector<32x32xf32>, vector<32x32xf32> -> vector<32x32xf32>
    %11 = arith.addf %7, %10 : vector<32x32xf32>
    %c0_13 = arith.constant 0 : index
    %c0_14 = arith.constant 0 : index
    %12 = vector.load %arg5[%c0_13, %c0_14] : memref<1x32xf32, #tpu.memory_space<vmem>>, vector<1x32xf32>
    %13 = vector.broadcast %12 : vector<1x32xf32> to vector<32x32xf32>
    %14 = arith.addf %11, %13 : vector<32x32xf32>
    %cst_15 = arith.constant 0.000000e+00 : f32
    %15 = vector.broadcast %cst_15 : f32 to vector<32x32xf32>
    %16 = arith.maximumf %14, %15 : vector<32x32xf32>
    %c0_16 = arith.constant 0 : index
    %c0_17 = arith.constant 0 : index
    %17 = vector.load %arg6[%c0_16, %c0_17] : memref<3x32xf32, #tpu.memory_space<vmem>>, vector<3x32xf32>
    %cst_18 = arith.constant dense<0.000000e+00> : vector<3x32xf32>
    %18 = tpu.matmul %17, %16, %cst_18 {dimension_numbers = #tpu.dot_dimension_numbers<[1], [0], [0], [1], [0, 0, 1, 1], [], []>} : vector<3x32xf32>, vector<32x32xf32>, vector<3x32xf32> -> vector<3x32xf32>
    %c0_19 = arith.constant 0 : index
    %c0_20 = arith.constant 0 : index
    %19 = vector.load %arg11[%c0_19, %c0_20] : memref<3x32xf32, #tpu.memory_space<vmem>>, vector<3x32xf32>
    tpu.vector_store %arg11[%c0_19, %c0_20], %18 {strides = array<i32>} : memref<3x32xf32, #tpu.memory_space<vmem>>, vector<3x32xf32>,
    %c0_21 = arith.constant 0 : index
    %c0_22 = arith.constant 0 : index
    %20 = vector.load %arg7[%c0_21, %c0_22] : memref<32x1xf32, #tpu.memory_space<vmem>>, vector<32x1xf32>
    %cst_23 = arith.constant dense<0.000000e+00> : vector<32x1xf32>
    %21 = tpu.matmul %16, %20, %cst_23 {dimension_numbers = #tpu.dot_dimension_numbers<[1], [0], [0], [1], [0, 0, 1, 1], [], []>} : vector<32x32xf32>, vector<32x1xf32>, vector<32x1xf32> -> vector<32x1xf32>
    %c0_24 = arith.constant 0 : index
    %c0_25 = arith.constant 0 : index
    %22 = vector.load %arg0[%c0_24, %c0_25] : memref<32x32xf32, #tpu.memory_space<vmem>>, vector<32x32xf32>
    %cst_26 = arith.constant dense<0.000000e+00> : vector<32x1xf32>
    %23 = tpu.matmul %22, %21, %cst_26 {dimension_numbers = #tpu.dot_dimension_numbers<[1], [0], [0], [1], [0, 0, 1, 1], [], []>} : vector<32x32xf32>, vector<32x1xf32>, vector<32x1xf32> -> vector<32x1xf32>
    %c0_27 = arith.constant 0 : index
    %c0_28 = arith.constant 0 : index
    %24 = vector.load %arg8[%c0_27, %c0_28] : memref<32x1xf32, #tpu.memory_space<vmem>>, vector<32x1xf32>
    %cst_29 = arith.constant dense<0.000000e+00> : vector<32x1xf32>
    %25 = tpu.matmul %16, %24, %cst_29 {dimension_numbers = #tpu.dot_dimension_numbers<[1], [0], [0], [1], [0, 0, 1, 1], [], []>} : vector<32x32xf32>, vector<32x1xf32>, vector<32x1xf32> -> vector<32x1xf32>
    %26 = arith.addf %23, %25 : vector<32x1xf32>
    %c0_30 = arith.constant 0 : index
    %c0_31 = arith.constant 0 : index
    %27 = vector.load %arg9[%c0_30, %c0_31] : memref<1x1xf32, #tpu.memory_space<vmem>>, vector<1x1xf32>
    %28 = vector.broadcast %27 : vector<1x1xf32> to vector<32x1xf32>
    %29 = arith.addf %26, %28 : vector<32x1xf32>
    %30 = math.tanh %29 : vector<32x1xf32>
    %31 = vector.broadcast %30 : vector<32x1xf32> to vector<32x32xf32>
    %32 = arith.mulf %16, %31 : vector<32x32xf32>
    %c0_32 = arith.constant 0 : index
    %c0_33 = arith.constant 0 : index
    %33 = vector.load %arg10[%c0_32, %c0_33] : memref<32x32xf32, #tpu.memory_space<vmem>>, vector<32x32xf32>
    tpu.vector_store %arg10[%c0_32, %c0_33], %32 {strides = array<i32>} : memref<32x32xf32, #tpu.memory_space<vmem>>, vector<32x32xf32>,
    %c0_34 = arith.constant 0 : index
    %c0_35 = arith.constant 0 : index
    %34 = vector.load %arg12[%c0_34, %c0_35] : memref<32x1xf32, #tpu.memory_space<vmem>>, vector<32x1xf32>
    tpu.vector_store %arg12[%c0_34, %c0_35], %29 {strides = array<i32>} : memref<32x1xf32, #tpu.memory_space<vmem>>, vector<32x1xf32>,
    return
  }
}

module attributes {stable_mosaic.version = 11 : i64} {
  func.func @fused_layer_kernel(%arg0: memref<32x32xf32, #tpu.memory_space<vmem>>, %arg1: memref<32x1xf32, #tpu.memory_space<vmem>>, %arg2: memref<32x16xf32, #tpu.memory_space<vmem>>, %arg3: memref<16x32xf32, #tpu.memory_space<vmem>>, %arg4: memref<16x32xf32, #tpu.memory_space<vmem>>, %arg5: memref<1x32xf32, #tpu.memory_space<vmem>>, %arg6: memref<3x32xf32, #tpu.memory_space<vmem>>, %arg7: memref<32x32xf32, #tpu.memory_space<vmem>>, %arg8: memref<3x32xf32, #tpu.memory_space<vmem>>) attributes {dimension_semantics = [], scalar_prefetch = 0 : i64, scratch_operands = 0 : i64, tpu.core_type = #tpu.core_type<tc>} {
    %c0 = arith.constant 0 : index
    %c0_0 = arith.constant 0 : index
    %0 = vector.load %arg0[%c0, %c0_0] : memref<32x32xf32, #tpu.memory_space<vmem>>, vector<32x32xf32>
    %c0_1 = arith.constant 0 : index
    %c0_2 = arith.constant 0 : index
    %1 = vector.load %arg2[%c0_1, %c0_2] : memref<32x16xf32, #tpu.memory_space<vmem>>, vector<32x16xf32>
    %cst = arith.constant dense<0.000000e+00> : vector<32x16xf32>
    %2 = tpu.matmul %0, %1, %cst {dimension_numbers = #tpu.dot_dimension_numbers<[1], [0], [0], [1], [0, 0, 1, 1], [], []>} : vector<32x32xf32>, vector<32x16xf32>, vector<32x16xf32> -> vector<32x16xf32>
    %c0_3 = arith.constant 0 : index
    %c0_4 = arith.constant 0 : index
    %3 = vector.load %arg1[%c0_3, %c0_4] : memref<32x1xf32, #tpu.memory_space<vmem>>, vector<32x1xf32>
    %4 = vector.broadcast %3 : vector<32x1xf32> to vector<32x16xf32>
    %5 = arith.mulf %2, %4 : vector<32x16xf32>
    %c0_5 = arith.constant 0 : index
    %c0_6 = arith.constant 0 : index
    %6 = vector.load %arg3[%c0_5, %c0_6] : memref<16x32xf32, #tpu.memory_space<vmem>>, vector<16x32xf32>
    %cst_7 = arith.constant dense<0.000000e+00> : vector<32x32xf32>
    %7 = tpu.matmul %5, %6, %cst_7 {dimension_numbers = #tpu.dot_dimension_numbers<[1], [0], [0], [1], [0, 0, 1, 1], [], []>} : vector<32x16xf32>, vector<16x32xf32>, vector<32x32xf32> -> vector<32x32xf32>
    %c0_8 = arith.constant 0 : index
    %c0_9 = arith.constant 0 : index
    %8 = vector.load %arg2[%c0_8, %c0_9] : memref<32x16xf32, #tpu.memory_space<vmem>>, vector<32x16xf32>
    %c0_10 = arith.constant 0 : index
    %c0_11 = arith.constant 0 : index
    %9 = vector.load %arg4[%c0_10, %c0_11] : memref<16x32xf32, #tpu.memory_space<vmem>>, vector<16x32xf32>
    %cst_12 = arith.constant dense<0.000000e+00> : vector<32x32xf32>
    %10 = tpu.matmul %8, %9, %cst_12 {dimension_numbers = #tpu.dot_dimension_numbers<[1], [0], [0], [1], [0, 0, 1, 1], [], []>} : vector<32x16xf32>, vector<16x32xf32>, vector<32x32xf32> -> vector<32x32xf32>
    %11 = arith.addf %7, %10 : vector<32x32xf32>
    %c0_13 = arith.constant 0 : index
    %c0_14 = arith.constant 0 : index
    %12 = vector.load %arg5[%c0_13, %c0_14] : memref<1x32xf32, #tpu.memory_space<vmem>>, vector<1x32xf32>
    %13 = vector.broadcast %12 : vector<1x32xf32> to vector<32x32xf32>
    %14 = arith.addf %11, %13 : vector<32x32xf32>
    %cst_15 = arith.constant 0.000000e+00 : f32
    %15 = vector.broadcast %cst_15 : f32 to vector<32x32xf32>
    %16 = arith.maximumf %14, %15 : vector<32x32xf32>
    %c0_16 = arith.constant 0 : index
    %c0_17 = arith.constant 0 : index
    %17 = vector.load %arg7[%c0_16, %c0_17] : memref<32x32xf32, #tpu.memory_space<vmem>>, vector<32x32xf32>
    tpu.vector_store %arg7[%c0_16, %c0_17], %16 {strides = array<i32>} : memref<32x32xf32, #tpu.memory_space<vmem>>, vector<32x32xf32>,
    %c0_18 = arith.constant 0 : index
    %c0_19 = arith.constant 0 : index
    %18 = vector.load %arg6[%c0_18, %c0_19] : memref<3x32xf32, #tpu.memory_space<vmem>>, vector<3x32xf32>
    %cst_20 = arith.constant dense<0.000000e+00> : vector<3x32xf32>
    %19 = tpu.matmul %18, %16, %cst_20 {dimension_numbers = #tpu.dot_dimension_numbers<[1], [0], [0], [1], [0, 0, 1, 1], [], []>} : vector<3x32xf32>, vector<32x32xf32>, vector<3x32xf32> -> vector<3x32xf32>
    %c0_21 = arith.constant 0 : index
    %c0_22 = arith.constant 0 : index
    %20 = vector.load %arg8[%c0_21, %c0_22] : memref<3x32xf32, #tpu.memory_space<vmem>>, vector<3x32xf32>
    tpu.vector_store %arg8[%c0_21, %c0_22], %19 {strides = array<i32>} : memref<3x32xf32, #tpu.memory_space<vmem>>, vector<3x32xf32>,
    return
  }
}

module attributes {stable_mosaic.version = 11 : i64} {
  func.func @fused_layer_kernel(%arg0: memref<26x26xf32, #tpu.memory_space<vmem>>, %arg1: memref<26x1xf32, #tpu.memory_space<vmem>>, %arg2: memref<26x32xf32, #tpu.memory_space<vmem>>, %arg3: memref<32x32xf32, #tpu.memory_space<vmem>>, %arg4: memref<32x32xf32, #tpu.memory_space<vmem>>, %arg5: memref<1x32xf32, #tpu.memory_space<vmem>>, %arg6: memref<3x26xf32, #tpu.memory_space<vmem>>, %arg7: memref<26x32xf32, #tpu.memory_space<vmem>>, %arg8: memref<3x32xf32, #tpu.memory_space<vmem>>) attributes {dimension_semantics = [], scalar_prefetch = 0 : i64, scratch_operands = 0 : i64, tpu.core_type = #tpu.core_type<tc>} {
    %c0 = arith.constant 0 : index
    %c0_0 = arith.constant 0 : index
    %0 = vector.load %arg0[%c0, %c0_0] : memref<26x26xf32, #tpu.memory_space<vmem>>, vector<26x26xf32>
    %c0_1 = arith.constant 0 : index
    %c0_2 = arith.constant 0 : index
    %1 = vector.load %arg2[%c0_1, %c0_2] : memref<26x32xf32, #tpu.memory_space<vmem>>, vector<26x32xf32>
    %cst = arith.constant dense<0.000000e+00> : vector<26x32xf32>
    %2 = tpu.matmul %0, %1, %cst {dimension_numbers = #tpu.dot_dimension_numbers<[1], [0], [0], [1], [0, 0, 1, 1], [], []>} : vector<26x26xf32>, vector<26x32xf32>, vector<26x32xf32> -> vector<26x32xf32>
    %c0_3 = arith.constant 0 : index
    %c0_4 = arith.constant 0 : index
    %3 = vector.load %arg1[%c0_3, %c0_4] : memref<26x1xf32, #tpu.memory_space<vmem>>, vector<26x1xf32>
    %4 = vector.broadcast %3 : vector<26x1xf32> to vector<26x32xf32>
    %5 = arith.mulf %2, %4 : vector<26x32xf32>
    %c0_5 = arith.constant 0 : index
    %c0_6 = arith.constant 0 : index
    %6 = vector.load %arg3[%c0_5, %c0_6] : memref<32x32xf32, #tpu.memory_space<vmem>>, vector<32x32xf32>
    %cst_7 = arith.constant dense<0.000000e+00> : vector<26x32xf32>
    %7 = tpu.matmul %5, %6, %cst_7 {dimension_numbers = #tpu.dot_dimension_numbers<[1], [0], [0], [1], [0, 0, 1, 1], [], []>} : vector<26x32xf32>, vector<32x32xf32>, vector<26x32xf32> -> vector<26x32xf32>
    %c0_8 = arith.constant 0 : index
    %c0_9 = arith.constant 0 : index
    %8 = vector.load %arg2[%c0_8, %c0_9] : memref<26x32xf32, #tpu.memory_space<vmem>>, vector<26x32xf32>
    %c0_10 = arith.constant 0 : index
    %c0_11 = arith.constant 0 : index
    %9 = vector.load %arg4[%c0_10, %c0_11] : memref<32x32xf32, #tpu.memory_space<vmem>>, vector<32x32xf32>
    %cst_12 = arith.constant dense<0.000000e+00> : vector<26x32xf32>
    %10 = tpu.matmul %8, %9, %cst_12 {dimension_numbers = #tpu.dot_dimension_numbers<[1], [0], [0], [1], [0, 0, 1, 1], [], []>} : vector<26x32xf32>, vector<32x32xf32>, vector<26x32xf32> -> vector<26x32xf32>
    %11 = arith.addf %7, %10 : vector<26x32xf32>
    %c0_13 = arith.constant 0 : index
    %c0_14 = arith.constant 0 : index
    %12 = vector.load %arg5[%c0_13, %c0_14] : memref<1x32xf32, #tpu.memory_space<vmem>>, vector<1x32xf32>
    %13 = vector.broadcast %12 : vector<1x32xf32> to vector<26x32xf32>
    %14 = arith.addf %11, %13 : vector<26x32xf32>
    %cst_15 = arith.constant 0.000000e+00 : f32
    %15 = vector.broadcast %cst_15 : f32 to vector<26x32xf32>
    %16 = arith.maximumf %14, %15 : vector<26x32xf32>
    %c0_16 = arith.constant 0 : index
    %c0_17 = arith.constant 0 : index
    %17 = vector.load %arg7[%c0_16, %c0_17] : memref<26x32xf32, #tpu.memory_space<vmem>>, vector<26x32xf32>
    tpu.vector_store %arg7[%c0_16, %c0_17], %16 {strides = array<i32>} : memref<26x32xf32, #tpu.memory_space<vmem>>, vector<26x32xf32>,
    %c0_18 = arith.constant 0 : index
    %c0_19 = arith.constant 0 : index
    %18 = vector.load %arg6[%c0_18, %c0_19] : memref<3x26xf32, #tpu.memory_space<vmem>>, vector<3x26xf32>
    %cst_20 = arith.constant dense<0.000000e+00> : vector<3x32xf32>
    %19 = tpu.matmul %18, %16, %cst_20 {dimension_numbers = #tpu.dot_dimension_numbers<[1], [0], [0], [1], [0, 0, 1, 1], [], []>} : vector<3x26xf32>, vector<26x32xf32>, vector<3x32xf32> -> vector<3x32xf32>
    %c0_21 = arith.constant 0 : index
    %c0_22 = arith.constant 0 : index
    %20 = vector.load %arg8[%c0_21, %c0_22] : memref<3x32xf32, #tpu.memory_space<vmem>>, vector<3x32xf32>
    tpu.vector_store %arg8[%c0_21, %c0_22], %19 {strides = array<i32>} : memref<3x32xf32, #tpu.memory_space<vmem>>, vector<3x32xf32>,
    return
  }
}

module attributes {stable_mosaic.version = 11 : i64} {
  func.func @fused_layer_kernel(%arg0: memref<26x26xf32, #tpu.memory_space<vmem>>, %arg1: memref<26x1xf32, #tpu.memory_space<vmem>>, %arg2: memref<26x32xf32, #tpu.memory_space<vmem>>, %arg3: memref<32x32xf32, #tpu.memory_space<vmem>>, %arg4: memref<32x32xf32, #tpu.memory_space<vmem>>, %arg5: memref<1x32xf32, #tpu.memory_space<vmem>>, %arg6: memref<3x26xf32, #tpu.memory_space<vmem>>, %arg7: memref<26x32xf32, #tpu.memory_space<vmem>>, %arg8: memref<3x32xf32, #tpu.memory_space<vmem>>) attributes {dimension_semantics = [], scalar_prefetch = 0 : i64, scratch_operands = 0 : i64, tpu.core_type = #tpu.core_type<tc>} {
    %c0 = arith.constant 0 : index
    %c0_0 = arith.constant 0 : index
    %0 = vector.load %arg0[%c0, %c0_0] : memref<26x26xf32, #tpu.memory_space<vmem>>, vector<26x26xf32>
    %c0_1 = arith.constant 0 : index
    %c0_2 = arith.constant 0 : index
    %1 = vector.load %arg2[%c0_1, %c0_2] : memref<26x32xf32, #tpu.memory_space<vmem>>, vector<26x32xf32>
    %cst = arith.constant dense<0.000000e+00> : vector<26x32xf32>
    %2 = tpu.matmul %0, %1, %cst {dimension_numbers = #tpu.dot_dimension_numbers<[1], [0], [0], [1], [0, 0, 1, 1], [], []>} : vector<26x26xf32>, vector<26x32xf32>, vector<26x32xf32> -> vector<26x32xf32>
    %c0_3 = arith.constant 0 : index
    %c0_4 = arith.constant 0 : index
    %3 = vector.load %arg1[%c0_3, %c0_4] : memref<26x1xf32, #tpu.memory_space<vmem>>, vector<26x1xf32>
    %4 = vector.broadcast %3 : vector<26x1xf32> to vector<26x32xf32>
    %5 = arith.mulf %2, %4 : vector<26x32xf32>
    %c0_5 = arith.constant 0 : index
    %c0_6 = arith.constant 0 : index
    %6 = vector.load %arg3[%c0_5, %c0_6] : memref<32x32xf32, #tpu.memory_space<vmem>>, vector<32x32xf32>
    %cst_7 = arith.constant dense<0.000000e+00> : vector<26x32xf32>
    %7 = tpu.matmul %5, %6, %cst_7 {dimension_numbers = #tpu.dot_dimension_numbers<[1], [0], [0], [1], [0, 0, 1, 1], [], []>} : vector<26x32xf32>, vector<32x32xf32>, vector<26x32xf32> -> vector<26x32xf32>
    %c0_8 = arith.constant 0 : index
    %c0_9 = arith.constant 0 : index
    %8 = vector.load %arg2[%c0_8, %c0_9] : memref<26x32xf32, #tpu.memory_space<vmem>>, vector<26x32xf32>
    %c0_10 = arith.constant 0 : index
    %c0_11 = arith.constant 0 : index
    %9 = vector.load %arg4[%c0_10, %c0_11] : memref<32x32xf32, #tpu.memory_space<vmem>>, vector<32x32xf32>
    %cst_12 = arith.constant dense<0.000000e+00> : vector<26x32xf32>
    %10 = tpu.matmul %8, %9, %cst_12 {dimension_numbers = #tpu.dot_dimension_numbers<[1], [0], [0], [1], [0, 0, 1, 1], [], []>} : vector<26x32xf32>, vector<32x32xf32>, vector<26x32xf32> -> vector<26x32xf32>
    %11 = arith.addf %7, %10 : vector<26x32xf32>
    %c0_13 = arith.constant 0 : index
    %c0_14 = arith.constant 0 : index
    %12 = vector.load %arg5[%c0_13, %c0_14] : memref<1x32xf32, #tpu.memory_space<vmem>>, vector<1x32xf32>
    %13 = vector.broadcast %12 : vector<1x32xf32> to vector<26x32xf32>
    %14 = arith.addf %11, %13 : vector<26x32xf32>
    %cst_15 = arith.constant 0.000000e+00 : f32
    %15 = vector.broadcast %cst_15 : f32 to vector<26x32xf32>
    %16 = arith.maximumf %14, %15 : vector<26x32xf32>
    %c0_16 = arith.constant 0 : index
    %c0_17 = arith.constant 0 : index
    %17 = vector.load %arg7[%c0_16, %c0_17] : memref<26x32xf32, #tpu.memory_space<vmem>>, vector<26x32xf32>
    tpu.vector_store %arg7[%c0_16, %c0_17], %16 {strides = array<i32>} : memref<26x32xf32, #tpu.memory_space<vmem>>, vector<26x32xf32>,
    %c0_18 = arith.constant 0 : index
    %c0_19 = arith.constant 0 : index
    %18 = vector.load %arg6[%c0_18, %c0_19] : memref<3x26xf32, #tpu.memory_space<vmem>>, vector<3x26xf32>
    %cst_20 = arith.constant dense<0.000000e+00> : vector<3x32xf32>
    %19 = tpu.matmul %18, %16, %cst_20 {dimension_numbers = #tpu.dot_dimension_numbers<[1], [0], [0], [1], [0, 0, 1, 1], [], []>} : vector<3x26xf32>, vector<26x32xf32>, vector<3x32xf32> -> vector<3x32xf32>
    %c0_21 = arith.constant 0 : index
    %c0_22 = arith.constant 0 : index
    %20 = vector.load %arg8[%c0_21, %c0_22] : memref<3x32xf32, #tpu.memory_space<vmem>>, vector<3x32xf32>
    tpu.vector_store %arg8[%c0_21, %c0_22], %19 {strides = array<i32>} : memref<3x32xf32, #tpu.memory_space<vmem>>, vector<3x32xf32>,
    return
  }
}

module attributes {stable_mosaic.version = 11 : i64} {
  func.func @mlp_head_kernel(%arg0: memref<3x32xf32, #tpu.memory_space<vmem>>, %arg1: memref<3x32xf32, #tpu.memory_space<vmem>>, %arg2: memref<3x32xf32, #tpu.memory_space<vmem>>, %arg3: memref<3x32xf32, #tpu.memory_space<vmem>>, %arg4: memref<32x32xf32, #tpu.memory_space<vmem>>, %arg5: memref<32x32xf32, #tpu.memory_space<vmem>>, %arg6: memref<32x32xf32, #tpu.memory_space<vmem>>, %arg7: memref<32x32xf32, #tpu.memory_space<vmem>>, %arg8: memref<1x32xf32, #tpu.memory_space<vmem>>, %arg9: memref<32x6xf32, #tpu.memory_space<vmem>>, %arg10: memref<1x6xf32, #tpu.memory_space<vmem>>, %arg11: memref<3x6xf32, #tpu.memory_space<vmem>>) attributes {dimension_semantics = [], scalar_prefetch = 0 : i64, scratch_operands = 0 : i64, tpu.core_type = #tpu.core_type<tc>} {
    %c0 = arith.constant 0 : index
    %c0_0 = arith.constant 0 : index
    %0 = vector.load %arg0[%c0, %c0_0] : memref<3x32xf32, #tpu.memory_space<vmem>>, vector<3x32xf32>
    %c0_1 = arith.constant 0 : index
    %c0_2 = arith.constant 0 : index
    %1 = vector.load %arg4[%c0_1, %c0_2] : memref<32x32xf32, #tpu.memory_space<vmem>>, vector<32x32xf32>
    %cst = arith.constant dense<0.000000e+00> : vector<3x32xf32>
    %2 = tpu.matmul %0, %1, %cst {dimension_numbers = #tpu.dot_dimension_numbers<[1], [0], [0], [1], [0, 0, 1, 1], [], []>} : vector<3x32xf32>, vector<32x32xf32>, vector<3x32xf32> -> vector<3x32xf32>
    %c0_3 = arith.constant 0 : index
    %c0_4 = arith.constant 0 : index
    %3 = vector.load %arg1[%c0_3, %c0_4] : memref<3x32xf32, #tpu.memory_space<vmem>>, vector<3x32xf32>
    %c0_5 = arith.constant 0 : index
    %c0_6 = arith.constant 0 : index
    %4 = vector.load %arg5[%c0_5, %c0_6] : memref<32x32xf32, #tpu.memory_space<vmem>>, vector<32x32xf32>
    %cst_7 = arith.constant dense<0.000000e+00> : vector<3x32xf32>
    %5 = tpu.matmul %3, %4, %cst_7 {dimension_numbers = #tpu.dot_dimension_numbers<[1], [0], [0], [1], [0, 0, 1, 1], [], []>} : vector<3x32xf32>, vector<32x32xf32>, vector<3x32xf32> -> vector<3x32xf32>
    %6 = arith.addf %2, %5 : vector<3x32xf32>
    %c0_8 = arith.constant 0 : index
    %c0_9 = arith.constant 0 : index
    %7 = vector.load %arg2[%c0_8, %c0_9] : memref<3x32xf32, #tpu.memory_space<vmem>>, vector<3x32xf32>
    %c0_10 = arith.constant 0 : index
    %c0_11 = arith.constant 0 : index
    %8 = vector.load %arg6[%c0_10, %c0_11] : memref<32x32xf32, #tpu.memory_space<vmem>>, vector<32x32xf32>
    %cst_12 = arith.constant dense<0.000000e+00> : vector<3x32xf32>
    %9 = tpu.matmul %7, %8, %cst_12 {dimension_numbers = #tpu.dot_dimension_numbers<[1], [0], [0], [1], [0, 0, 1, 1], [], []>} : vector<3x32xf32>, vector<32x32xf32>, vector<3x32xf32> -> vector<3x32xf32>
    %10 = arith.addf %6, %9 : vector<3x32xf32>
    %c0_13 = arith.constant 0 : index
    %c0_14 = arith.constant 0 : index
    %11 = vector.load %arg3[%c0_13, %c0_14] : memref<3x32xf32, #tpu.memory_space<vmem>>, vector<3x32xf32>
    %c0_15 = arith.constant 0 : index
    %c0_16 = arith.constant 0 : index
    %12 = vector.load %arg7[%c0_15, %c0_16] : memref<32x32xf32, #tpu.memory_space<vmem>>, vector<32x32xf32>
    %cst_17 = arith.constant dense<0.000000e+00> : vector<3x32xf32>
    %13 = tpu.matmul %11, %12, %cst_17 {dimension_numbers = #tpu.dot_dimension_numbers<[1], [0], [0], [1], [0, 0, 1, 1], [], []>} : vector<3x32xf32>, vector<32x32xf32>, vector<3x32xf32> -> vector<3x32xf32>
    %14 = arith.addf %10, %13 : vector<3x32xf32>
    %c0_18 = arith.constant 0 : index
    %c0_19 = arith.constant 0 : index
    %15 = vector.load %arg8[%c0_18, %c0_19] : memref<1x32xf32, #tpu.memory_space<vmem>>, vector<1x32xf32>
    %16 = vector.broadcast %15 : vector<1x32xf32> to vector<3x32xf32>
    %17 = arith.addf %14, %16 : vector<3x32xf32>
    %cst_20 = arith.constant 0.000000e+00 : f32
    %18 = vector.broadcast %cst_20 : f32 to vector<3x32xf32>
    %19 = arith.maximumf %17, %18 : vector<3x32xf32>
    %c0_21 = arith.constant 0 : index
    %c0_22 = arith.constant 0 : index
    %20 = vector.load %arg9[%c0_21, %c0_22] : memref<32x6xf32, #tpu.memory_space<vmem>>, vector<32x6xf32>
    %cst_23 = arith.constant dense<0.000000e+00> : vector<3x6xf32>
    %21 = tpu.matmul %19, %20, %cst_23 {dimension_numbers = #tpu.dot_dimension_numbers<[1], [0], [0], [1], [0, 0, 1, 1], [], []>} : vector<3x32xf32>, vector<32x6xf32>, vector<3x6xf32> -> vector<3x6xf32>
    %c0_24 = arith.constant 0 : index
    %c0_25 = arith.constant 0 : index
    %22 = vector.load %arg10[%c0_24, %c0_25] : memref<1x6xf32, #tpu.memory_space<vmem>>, vector<1x6xf32>
    %23 = vector.broadcast %22 : vector<1x6xf32> to vector<3x6xf32>
    %24 = arith.addf %21, %23 : vector<3x6xf32>
    %cst_26 = arith.constant dense<0xFF800000> : vector<3xf32>
    %25 = vector.multi_reduction <maximumf>, %24, %cst_26 [1] : vector<3x6xf32> to vector<3xf32>
    %26 = vector.shape_cast %25 : vector<3xf32> to vector<3x1xf32>
    %27 = vector.broadcast %26 : vector<3x1xf32> to vector<3x6xf32>
    %28 = arith.subf %24, %27 : vector<3x6xf32>
    %29 = math.exp %28 : vector<3x6xf32>
    %cst_27 = arith.constant dense<0.000000e+00> : vector<3xf32>
    %30 = vector.multi_reduction <add>, %29, %cst_27 [1] : vector<3x6xf32> to vector<3xf32>
    %31 = vector.shape_cast %30 : vector<3xf32> to vector<3x1xf32>
    %32 = math.log %31 : vector<3x1xf32>
    %33 = vector.broadcast %32 : vector<3x1xf32> to vector<3x6xf32>
    %34 = arith.subf %28, %33 : vector<3x6xf32>
    %c0_28 = arith.constant 0 : index
    %c0_29 = arith.constant 0 : index
    %35 = vector.load %arg11[%c0_28, %c0_29] : memref<3x6xf32, #tpu.memory_space<vmem>>, vector<3x6xf32>
    tpu.vector_store %arg11[%c0_28, %c0_29], %34 {strides = array<i32>} : memref<3x6xf32, #tpu.memory_space<vmem>>, vector<3x6xf32>,
    return
  }
}

</mosaic_0001>

<bundles_post_ra>
// kernel: net_forward.6
= control target key start
LH: loop header
LB: loop body
LE: loop exit
PB: predicated region body
PF: predicated region fallthrough
CT: control target
= control target key end

     0   :  { %vm48_vm0 = vcmask 261120   ;;  %v1073_v3 = vmov 0   ;;  %v1074_v45 = vmov 0.0|0.0   ;;  %vm1075_vm1 = vmmov 0   ;;  %s1331_s2 = inlined_call_operand.vmem [shape: f32[32,32], index: 2, kind: input, shape index: {}]   ;;  %s1332_s0 = inlined_call_operand.vmem [shape: f32[32,32], index: 0, kind: input, shape index: {}]   ;;  %s1333_s1 = inlined_call_operand.vmem [shape: f32[32,1], index: 1, kind: input, shape index: {}]   ;;  %s1334_s4 = inlined_call_operand.vmem [shape: f32[32,32], index: 4, kind: input, shape index: {}]   ;;  %s1335_s3 = inlined_call_operand.vmem [shape: f32[32,32], index: 3, kind: input, shape index: {}]   ;;  %s1336_s8 = inlined_call_operand.vmem [shape: f32[32,1], index: 8, kind: input, shape index: {}]   ;;  %s1337_s5 = inlined_call_operand.vmem [shape: f32[1,32], index: 5, kind: input, shape index: {}]   ;;  %s1338_s7 = inlined_call_operand.vmem [shape: f32[32,1], index: 7, kind: input, shape index: {}]   ;;  %s1339_s6 = inlined_call_operand.vmem [shape: f32[3,32], index: 6, kind: input, shape index: {}]   ;;  %s1340_s9 = inlined_call_operand.<no memory space> [shape: f32[1,1], index: 9, kind: input, shape index: {}]   ;;  %s1341_s11 = inlined_call_operand.vmem [shape: f32[3,32], index: 11, kind: output, shape index: {1}]   ;;  %s1342_s12 = inlined_call_operand.vmem [shape: f32[32,1], index: 12, kind: output, shape index: {2}]   ;;  %s1343_s10 = inlined_call_operand.vmem [shape: f32[32,32], index: 10, kind: output, shape index: {0}]  }
   0x1   :  { %v44_v0 = vld [vmem:[%s1331_s2] sm:$0xff]  ;;  %v45_v1 = vld [vmem:[%s1331_s2 + $0x8] sm:$0xff]  ;;  %v46_v2 = vld [vmem:[%s1331_s2 + $0x10] sm:$0xff]  ;;  %1063 = vset.pattern.permute.xlu0 %v1073_v3  ;;  %1064 = vset.pattern.permute.xlu1 %v1073_v3  ;;  %v1076_v46 = vmov 0.0   ;;  %vm465_vm2 = vcmask 256000   ;;  %vm801_vm3 = vcmask 7168  }
   0x2   :  { %v993_v4 = vpack.c.bf16 %v45_v1, %v44_v0  ;;  %v47_v5 = vld [vmem:[%s1331_s2 + $0x18] sm:$0xff]  ;;  %v1157_v6 = vld [vmem:[%s1332_s0] sm:$0xff]  ;;  %920 = vmatprep.mubr.msk.f32.mxu1 %vm48_vm0, %v44_v0  ;;  %v148_v9 = vld [vmem:[%s1333_s1 + $0x10] sm:$0xff] }
   0x3   :  { %v997_v7 = vpack.c.bf16 %v47_v5, %v46_v2  ;;  %906 = vmatprep.mubr.msk.f32.mxu0 %vm48_vm0, %v1157_v6  ;;  %v146_v8 = vld [vmem:[%s1333_s1] sm:$0xff]  ;;  %v147_v10 = vld [vmem:[%s1333_s1 + $0x8] sm:$0xff]  ;;  %162 = vperm.xlu1 %1064, %v148_v9   ;;  %v180_v13 = vld [vmem:[%s1334_s4 + $0x10] sm:$0xff] }
   0x4   :  { %994 = vmatprep.subr.bf16.mxu0 %v993_v4  ;;  %152 = vperm.xlu0 %1063, %v146_v8   ;;  %v178_v11 = vld [vmem:[%s1334_s4] sm:$0xff]  ;;  %v179_v12 = vld [vmem:[%s1334_s4 + $0x8] sm:$0xff]  ;;  %v149_v14 = vld [vmem:[%s1333_s1 + $0x18] sm:$0xff] }
   0x5   :  { %996 = vmatpush3.bf16.msra.mxu0 %v993_v4  ;;  %v1001_v15 = vpack.c.bf16 %v179_v12, %v178_v11  ;;  %v181_v16 = vld [vmem:[%s1334_s4 + $0x18] sm:$0xff]  ;;  %v174_v18 = vld [vmem:[%s1335_s3] sm:$0xff]  ;;  %v175_v19 = vld [vmem:[%s1335_s3 + $0x8] sm:$0xff] }
   0x6   :  { %998 = vmatprep.subr.bf16.mxu0 %v997_v7  ;;  %v1005_v17 = vpack.c.bf16 %v181_v16, %v180_v13  ;;  %v1195_v20 = vld [vmem:[%s1332_s0 + $0x8] sm:$0xff]  ;;  %v1200_v21 = vld [vmem:[%s1332_s0 + $0x10] sm:$0xff]  ;;  %v1009_v22 = vpack.c.bf16 %v175_v19, %v174_v18  ;;  %v1209_v23 = vld [vmem:[%s1332_s0 + $0x18] sm:$0xff] }
   0x7   :  { %1002 = vmatprep.subr.bf16.mxu1 %v1001_v15  ;;  %167 = vperm.xlu1 %1064, %v149_v14   ;;  %v176_v24 = vld [vmem:[%s1335_s3 + $0x10] sm:$0xff]  ;;  %v177_v25 = vld [vmem:[%s1335_s3 + $0x18] sm:$0xff]  ;;  %v572_v27 = vld [vmem:[%s1336_s8] sm:$0xff] }
   0x8   :  { %157 = vperm.xlu0 %1063, %v147_v10   ;;  %1004 = vmatpush3.bf16.msra.mxu1 %v1001_v15  ;;  %v1013_v26 = vpack.c.bf16 %v177_v25, %v176_v24  ;;  %v573_v28 = vld [vmem:[%s1336_s8 + $0x8] sm:$0xff]  ;;  %v574_v42 = vld [vmem:[%s1336_s8 + $0x10] sm:$0xff]  ;;  %v575_v43 = vld [vmem:[%s1336_s8 + $0x18] sm:$0xff] }
   0x9   :  { %1000 = vmatpush3.bf16.msra.mxu0 %v997_v7  ;;  %1006 = vmatprep.subr.bf16.mxu1 %v1005_v17  ;;  %v1031_v29 = vpack.c.bf16 %v573_v28, %v572_v27  ;;  %v1035_v44 = vpack.c.bf16 %v575_v43, %v574_v42  ;;  %v830_v47 = vld [vmem:[%s1337_s5] ss:$0 sm:$0xff]  ;;  %v468_v60 = vld [vmem:[%s1338_s7 + $0x8] sm:$0xff] }
   0xa   :  { %1017 = vmatprep.subr.bf16.mxu0 %v1074_v45  ;;  %v467_v59 = vld [vmem:[%s1338_s7] sm:$0xff] }
   0xb   :  { %v1023_v63 = vpack.c.bf16 %v468_v60, %v467_v59  ;;  %v391_v3 = vld [vmem:[%s1339_s6] sm:$0x7] }
   0xc   :  { %907 = vmatmul.mubr.msk.f32.vlgmr.msra.gmra.mrb[0].mxu0 %vm48_vm0, %v1195_v20  ;;  %1008 = vmatpush3.bf16.msra.mxu1 %v1005_v17 }
   0xd   :  { %909 = vmatprep.mubr.msk.f32.mxu0 %vm48_vm0, %v1200_v21  ;;  %1010 = vmatprep.subr.bf16.mxu1 %v1009_v22 }
   0xf   :  { %921 = vmatmul.mubr.msk.f32.vlgmr.msra.gmra.mrb[0].mxu1 %vm48_vm0, %v45_v1  ;;  %v469_v1 = vld [vmem:[%s1338_s7 + $0x10] sm:$0xff] }
  0x10   :  { %910 = vmatmul.mubr.msk.f32.gmra.mrb[2].mxu0 %vm48_vm0, %v1209_v23  ;;  %1012 = vmatpush3.bf16.msra.mxu1 %v1009_v22 }
  0x11   :  { %923 = vmatprep.mubr.msk.f32.mxu1 %vm48_vm0, %v46_v2  ;;  %1014 = vmatprep.subr.bf16.mxu1 %v1013_v26  ;;  %v470_v2 = vld [vmem:[%s1338_s7 + $0x18] sm:$0xff] }
  0x12   :  { %948 = vmatprep.mubr.msk.f32.mxu0 %vm1075_vm1, %v1076_v46  ;;  %v1027_v4 = vpack.c.bf16 %v470_v2, %v469_v1 }
  0x13   :  { %924 = vmatmul.mubr.msk.f32.gmra.mrb[2].mxu1 %vm48_vm0, %v47_v5  ;;  %v18_v5 = vstv %s1340_s9 }
  0x14   :  { %1016 = vmatpush3.bf16.msra.mxu1 %v1013_v26  ;;  %19 = vst [vmem:[#allocation2] sm:$0x1] %v18_v5 }
  0x15   :  { %1032 = vmatprep.subr.bf16.mxu1 %v1031_v29 }
  0x1b   :  { %v844_v16 = vld [vmem:[#allocation2] ss:$0 sm:$0xff] }
  0x82   :  { %v163_v31 = vpop.permute.xlu1 %162 }
  0x83   :  { %v153_v30 = vpop.permute.xlu0 %152 }
  0x86   :  { %v168_v39 = vpop.permute.xlu1 %167 }
  0x87   :  { %v158_v34 = vpop.permute.xlu0 %157 }
  0xdf   :  { %v908_v32 = vpop.f32.mrb[0].mxu0 }
  0xe0   :  { %v127_v33 = vpop.f32.mrb[1].mxu0  ;;  %v171_v36 = vmul.f32 %v908_v32, %v158_v34 }
  0xe1   :  { %v170_v35 = vmul.f32 %v153_v30, %v127_v33 }
  0xe3   :  { %v911_v37 = vpop.f32.mrb[2].mxu0  ;;  %934 = vmatprep.mubr.msk.f32.mxu1 %vm48_vm0, %v170_v35 }
  0xe4   :  { %v137_v38 = vpop.f32.mrb[3].mxu0  ;;  %935 = vmatmul.mubr.msk.f32.vlgmr.msra.gmra.mrb[0].mxu1 %vm48_vm0, %v171_v36  ;;  %v173_v41 = vmul.f32 %v911_v37, %v168_v39 }
  0xe5   :  { %v172_v40 = vmul.f32 %v163_v31, %v137_v38  ;;  %1034 = vmatpush3.bf16.msra.mxu1 %v1031_v29 }
  0xe6   :  { %1036 = vmatprep.subr.bf16.mxu1 %v1035_v44 }
  0xe7   :  { %937 = vmatprep.mubr.msk.f32.mxu1 %vm48_vm0, %v172_v40 }
  0xe8   :  { %938 = vmatmul.mubr.msk.f32.gmra.mrb[2].mxu1 %vm48_vm0, %v173_v41 }
  0xe9   :  { %1038 = vmatpush3.bf16.msra.mxu1 %v1035_v44 }
 0x1b7   :  { %v936_v48 = vpop.f32.mrb[0].mxu1 }
 0x1b8   :  { %v384_v49 = vadd.f32 %v936_v48, %v830_v47  ;;  %v357_v50 = vpop.f32.mrb[1].mxu1 }
 0x1b9   :  { %v383_v51 = vadd.f32 %v830_v47, %v357_v50 }
 0x1ba   :  { %v1241_v52 = vmax.f32 %v384_v49, 0.0 }
 0x1bb   :  { %v1243_v53 = vmax.f32 %v383_v51, 0.0  ;;  %v939_v54 = vpop.f32.mrb[2].mxu1 }
 0x1bc   :  { %v386_v55 = vadd.f32 %v939_v54, %v830_v47  ;;  %v367_v56 = vpop.f32.mrb[3].mxu1 }
 0x1bd   :  { %v385_v57 = vadd.f32 %v830_v47, %v367_v56  ;;  %973 = vmatprep.mubr.msk.f32.mxu1 %vm48_vm0, %v1243_v53  ;;  %v1018_v58 = vpack.c.bf16 %v1241_v52, %v1243_v53 }
 0x1be   :  { %v1255_v61 = vmax.f32 %v386_v55, 0.0  ;;  %974 = vmatmul.mubr.msk.f32.vlgmr.msra.gmra.mrb[4].mxu1 %vm48_vm0, %v1241_v52 }
 0x1bf   :  { %v1259_v62 = vmax.f32 %v385_v57, 0.0  ;;  %1019 = vmatpush3.bf16.msra.mxu0 %v1018_v58 }
 0x1c0   :  { %1020 = vmatprep.subr.bf16.mxu0 %v1074_v45 }
 0x1c1   :  { %976 = vmatprep.mubr.msk.f32.mxu1 %vm48_vm0, %v1259_v62  ;;  %v1021_v0 = vpack.c.bf16 %v1255_v61, %v1259_v62 }
 0x1c2   :  { %977 = vmatmul.mubr.msk.f32.gmra.mrb[6].mxu1 %vm48_vm0, %v1255_v61 }
 0x1c3   :  { %1022 = vmatpush3.bf16.msra.mxu0 %v1021_v0  ;;  %990 = vmatprep.mubr.msk.f32.mxu1 %vm48_vm0, %v1200_v21 }
 0x1c4   :  { %1024 = vmatprep.subr.bf16.mxu0 %v1023_v63 }
 0x1c6   :  { %949 = vmatmul.mubr.msk.f32.vlgmr.msra.gmra.mrb[4].mxu0 %vm48_vm0, %v391_v3 }
 0x1c7   :  { %1026 = vmatpush3.bf16.msra.mxu0 %v1023_v63  ;;  %959 = vmatprep.mubr.msk.f32.mxu0 %vm48_vm0, %v1243_v53 }
 0x1c8   :  { %1028 = vmatprep.subr.bf16.mxu0 %v1027_v4 }
 0x1cb   :  { %1030 = vmatpush3.bf16.msra.mxu0 %v1027_v4 }
 0x1ce   :  { %960 = vmatmul.mubr.msk.f32.vlgmr.msra.gmra.mrb[6].mxu0 %vm48_vm0, %v1241_v52 }
 0x1cf   :  { %962 = vmatprep.mubr.msk.f32.mxu0 %vm48_vm0, %v1259_v62 }
 0x1d2   :  { %963 = vmatmul.mubr.msk.f32.gmra.mrb[8].mxu0 %vm48_vm0, %v1255_v61 }
 0x1d3   :  { %987 = vmatprep.mubr.msk.f32.mxu0 %vm48_vm0, %v1157_v6 }
 0x291   :  { %v975_v7 = vpop.f32.mrb[4].mxu1 }
 0x292   :  { %v642_v8 = vpop.f32.mrb[5].mxu1 }
 0x299   :  { %v461_v9 = vpop.f32.mrb[4].mxu0 }
 0x29a   :  { %466 = vst.msk [vmem:[%s1341_s11] sm:$0x7] %vm465_vm2, %v461_v9  ;;  %v950_v10 = vpop.f32.mrb[5].mxu0 }
 0x2a1   :  { %v961_v11 = vpop.f32.mrb[6].mxu0 }
 0x2a2   :  { %v549_v12 = vpop.f32.mrb[7].mxu0 }
 0x2a3   :  { %v1039_v13 = vpack.c.bf16 %v961_v11, %v549_v12 }
 0x2a5   :  { %v964_v14 = vpop.f32.mrb[8].mxu0  ;;  %1040 = vmatprep.subr.bf16.mxu0 %v1039_v13  ;;  %1047 = vmatprep.subr.bf16.mxu1 %v1039_v13 }
 0x2a6   :  { %v559_v6 = vpop.f32.mrb[9].mxu0  ;;  %1042 = vmatpush3.bf16.msra.mxu0 %v1039_v13  ;;  %1049 = vmatpush3.bf16.msra.mxu1 %v1039_v13 }
 0x2a7   :  { %v1043_v15 = vpack.c.bf16 %v964_v14, %v559_v6 }
 0x2a9   :  { %1044 = vmatprep.subr.bf16.mxu0 %v1043_v15  ;;  %1048 = vmatprep.subr.bf16.mxu1 %v1043_v15 }
 0x2aa   :  { %1046 = vmatpush3.bf16.msra.mxu0 %v1043_v15  ;;  %1050 = vmatpush3.bf16.msra.mxu1 %v1043_v15 }
 0x2ad   :  { %988 = vmatmul.mubr.msk.f32.vlgmr.msra.gmra.mrb[10].mxu0 %vm48_vm0, %v1195_v20  ;;  %991 = vmatmul.mubr.msk.f32.vlgmr.msra.gmra.mrb[6].mxu1 %vm48_vm0, %v1209_v23 }
 0x380   :  { %v989_v17 = vpop.f32.mrb[10].mxu0  ;;  %v992_v18 = vpop.f32.mrb[6].mxu1 }
 0x381   :  { %v745_v19 = vadd.f32 %v989_v17, %v975_v7  ;;  %v768_v21 = vadd.f32 %v992_v18, %v844_v16  ;;  %v739_v22 = vpop.f32.mrb[11].mxu0  ;;  %v749_v24 = vpop.f32.mrb[7].mxu1 }
 0x382   :  { %v740_v25 = vadd.f32 %v739_v22, %v642_v8  ;;  %v767_v26 = vadd.f32 %v844_v16, %v749_v24 }
 0x383   :  { %v766_v27 = vadd.f32 %v844_v16, %v745_v19  ;;  %805 = vst.msk [vmem:[%s1342_s12 + $0x18] sm:$0xff] %vm801_vm3, %v768_v21 }
 0x384   :  { %v765_v28 = vadd.f32 %v844_v16, %v740_v25  ;;  %804 = vst.msk [vmem:[%s1342_s12 + $0x10] sm:$0xff] %vm801_vm3, %v767_v26 }
 0x385   :  { %1065 = vtanh.f32 %v766_v27  ;;  %803 = vst.msk [vmem:[%s1342_s12 + $0x8] sm:$0xff] %vm801_vm3, %v766_v27 }
 0x386   :  { %1067 = vtanh.f32 %v765_v28  ;;  %802 = vst.msk [vmem:[%s1342_s12] sm:$0xff] %vm801_vm3, %v765_v28 }
 0x387   :  { %1069 = vtanh.f32 %v768_v21 }
 0x388   :  { %1071 = vtanh.f32 %v767_v26 }
 0x38f   :  { %v1066_v20 = vpop.eup %1065 }
 0x390   :  { %v1068_v23 = vpop.eup %1067  ;;  %780 = vperm.xlu1 %1064, %v1066_v20  }
 0x391   :  { %775 = vperm.xlu0 %1063, %v1068_v23   ;;  %v1070_v29 = vpop.eup %1069 }
 0x392   :  { %v1072_v30 = vpop.eup %1071 }
 0x394   :  { %790 = vperm.xlu1 %1064, %v1070_v29  }
 0x395   :  { %785 = vperm.xlu0 %1063, %v1072_v30  }
 0x40f   :  { %v781_v31 = vpop.permute.xlu1 %780 }
 0x410   :  { %v794_v32 = vmul.f32 %v781_v31, %v1241_v52  ;;  %v776_v33 = vpop.permute.xlu0 %775 }
 0x411   :  { %v793_v34 = vmul.f32 %v776_v33, %v1243_v53 }
 0x412   :  { %798 = vst.msk [vmem:[%s1343_s10 + $0x8] sm:$0xff] %vm48_vm0, %v794_v32 }
 0x413   :  { %797 = vst.msk [vmem:[%s1343_s10] sm:$0xff] %vm48_vm0, %v793_v34  ;;  %v791_v35 = vpop.permute.xlu1 %790 }
 0x414   :  { %v796_v36 = vmul.f32 %v791_v35, %v1255_v61  ;;  %v786_v37 = vpop.permute.xlu0 %785 }
 0x415   :  { %v795_v38 = vmul.f32 %v786_v37, %v1259_v62 }
 0x416   :  { %800 = vst.msk [vmem:[%s1343_s10 + $0x18] sm:$0xff] %vm48_vm0, %v796_v36 }
 0x417   :  { %799 = vst.msk [vmem:[%s1343_s10 + $0x10] sm:$0xff] %vm48_vm0, %v795_v38 }

// kernel: net_forward.5
= control target key start
LH: loop header
LB: loop body
LE: loop exit
PB: predicated region body
PF: predicated region fallthrough
CT: control target
= control target key end

     0   :  { %vm36_vm0 = vcmask 261120   ;;  %v580_v3 = vmov 0   ;;  %vm166_vm1 = vcmask 130048   ;;  %v581_v33 = vmov 0.0|0.0   ;;  %s715_s2 = inlined_call_operand.vmem [shape: f32[32,16], index: 2, kind: input, shape index: {}]   ;;  %s716_s0 = inlined_call_operand.vmem [shape: f32[32,32], index: 0, kind: input, shape index: {}]   ;;  %s717_s1 = inlined_call_operand.vmem [shape: f32[32,1], index: 1, kind: input, shape index: {}]   ;;  %s718_s4 = inlined_call_operand.vmem [shape: f32[16,32], index: 4, kind: input, shape index: {}]   ;;  %s719_s3 = inlined_call_operand.vmem [shape: f32[16,32], index: 3, kind: input, shape index: {}]   ;;  %s720_s5 = inlined_call_operand.vmem [shape: f32[1,32], index: 5, kind: input, shape index: {}]   ;;  %s721_s7 = inlined_call_operand.vmem [shape: f32[32,32], index: 7, kind: output, shape index: {0}]   ;;  %s722_s6 = inlined_call_operand.vmem [shape: f32[3,32], index: 6, kind: input, shape index: {}]   ;;  %s723_s8 = inlined_call_operand.vmem [shape: f32[3,32], index: 8, kind: output, shape index: {1}]  }
   0x1   :  { %v32_v0 = vld [vmem:[%s715_s2] sm:$0xff]  ;;  %v33_v1 = vld [vmem:[%s715_s2 + $0x8] sm:$0xff]  ;;  %v34_v2 = vld [vmem:[%s715_s2 + $0x10] sm:$0xff]  ;;  %578 = vset.pattern.permute.xlu0 %v580_v3  ;;  %579 = vset.pattern.permute.xlu1 %v580_v3  ;;  %vm582_vm2 = vmmov 0   ;;  %v583_v34 = vmov 0.0   ;;  %vm454_vm3 = vcmask 256000  }
   0x2   :  { %v548_v4 = vpack.c.bf16 %v33_v1, %v32_v0  ;;  %v35_v5 = vld [vmem:[%s715_s2 + $0x18] sm:$0xff]  ;;  %v28_v6 = vld [vmem:[%s716_s0] sm:$0xff]  ;;  %v136_v9 = vld [vmem:[%s717_s1 + $0x10] sm:$0xff]  ;;  %521 = vmatprep.mubr.msk.f32.mxu1 %vm166_vm1, %v32_v0 }
   0x3   :  { %v552_v7 = vpack.c.bf16 %v35_v5, %v34_v2  ;;  %511 = vmatprep.mubr.msk.f32.mxu0 %vm36_vm0, %v28_v6  ;;  %v134_v8 = vld [vmem:[%s717_s1] sm:$0xff]  ;;  %v135_v10 = vld [vmem:[%s717_s1 + $0x8] sm:$0xff]  ;;  %150 = vperm.xlu1 %579, %v136_v9   ;;  %v137_v14 = vld [vmem:[%s717_s1 + $0x18] sm:$0xff] }
   0x4   :  { %549 = vmatprep.subr.bf16.mxu0 %v548_v4  ;;  %140 = vperm.xlu0 %578, %v134_v8   ;;  %v164_v11 = vld [vmem:[%s718_s4] sm:$0xff]  ;;  %v165_v12 = vld [vmem:[%s718_s4 + $0x8] sm:$0xff]  ;;  %v30_v19 = vld [vmem:[%s716_s0 + $0x10] sm:$0xff] }
   0x5   :  { %551 = vmatpush3.bf16.msra.mxu0 %v548_v4  ;;  %v162_v13 = vld [vmem:[%s719_s3] sm:$0xff]  ;;  %v556_v15 = vpack.c.bf16 %v165_v12, %v164_v11  ;;  %v163_v16 = vld [vmem:[%s719_s3 + $0x8] sm:$0xff]  ;;  %v31_v20 = vld [vmem:[%s716_s0 + $0x18] sm:$0xff] }
   0x6   :  { %553 = vmatprep.subr.bf16.mxu0 %v552_v7  ;;  %v560_v17 = vpack.c.bf16 %v163_v16, %v162_v13  ;;  %v29_v18 = vld [vmem:[%s716_s0 + $0x8] sm:$0xff]  ;;  %v476_v35 = vld [vmem:[%s720_s5] ss:$0 sm:$0xff] }
   0x7   :  { %557 = vmatprep.subr.bf16.mxu1 %v556_v15  ;;  %155 = vperm.xlu1 %579, %v137_v14   ;;  %v380_v50 = vld [vmem:[%s722_s6] sm:$0x7] }
   0x8   :  { %145 = vperm.xlu0 %578, %v135_v10   ;;  %559 = vmatpush3.bf16.msra.mxu1 %v556_v15 }
   0x9   :  { %555 = vmatpush3.bf16.msra.mxu0 %v552_v7  ;;  %561 = vmatprep.subr.bf16.mxu1 %v560_v17 }
   0xa   :  { %564 = vmatprep.subr.bf16.mxu0 %v581_v33 }
   0xb   :  { %522 = vmatmul.mubr.msk.f32.vlgmr.msra.gmra.mrb[0].mxu1 %vm166_vm1, %v33_v1 }
   0xc   :  { %512 = vmatmul.mubr.msk.f32.vlgmr.msra.gmra.mrb[0].mxu0 %vm36_vm0, %v29_v18  ;;  %563 = vmatpush3.bf16.msra.mxu1 %v560_v17 }
   0xd   :  { %514 = vmatprep.mubr.msk.f32.mxu0 %vm36_vm0, %v30_v19  ;;  %524 = vmatprep.mubr.msk.f32.mxu1 %vm166_vm1, %v34_v2 }
   0xf   :  { %525 = vmatmul.mubr.msk.f32.gmra.mrb[2].mxu1 %vm166_vm1, %v35_v5 }
  0x10   :  { %515 = vmatmul.mubr.msk.f32.gmra.mrb[2].mxu0 %vm36_vm0, %v31_v20 }
  0x11   :  { %545 = vmatprep.mubr.msk.f32.mxu0 %vm582_vm2, %v583_v34 }
  0x82   :  { %v151_v22 = vpop.permute.xlu1 %150 }
  0x83   :  { %v141_v21 = vpop.permute.xlu0 %140 }
  0x86   :  { %v156_v30 = vpop.permute.xlu1 %155 }
  0x87   :  { %v146_v25 = vpop.permute.xlu0 %145 }
  0xdf   :  { %v513_v23 = vpop.f32.mrb[0].mxu0 }
  0xe0   :  { %v115_v24 = vpop.f32.mrb[1].mxu0  ;;  %v159_v27 = vmul.f32 %v513_v23, %v146_v25 }
  0xe1   :  { %v158_v26 = vmul.f32 %v141_v21, %v115_v24 }
  0xe3   :  { %v516_v28 = vpop.f32.mrb[2].mxu0  ;;  %531 = vmatprep.mubr.msk.f32.mxu1 %vm166_vm1, %v158_v26 }
  0xe4   :  { %v125_v29 = vpop.f32.mrb[3].mxu0  ;;  %532 = vmatmul.mubr.msk.f32.vlgmr.msra.gmra.mrb[0].mxu1 %vm166_vm1, %v159_v27  ;;  %v161_v32 = vmul.f32 %v516_v28, %v156_v30 }
  0xe5   :  { %v160_v31 = vmul.f32 %v151_v22, %v125_v29 }
  0xe7   :  { %534 = vmatprep.mubr.msk.f32.mxu1 %vm166_vm1, %v160_v31 }
  0xe8   :  { %535 = vmatmul.mubr.msk.f32.gmra.mrb[2].mxu1 %vm166_vm1, %v161_v32 }
 0x1b7   :  { %v533_v36 = vpop.f32.mrb[0].mxu1 }
 0x1b8   :  { %v369_v37 = vadd.f32 %v533_v36, %v476_v35  ;;  %v342_v38 = vpop.f32.mrb[1].mxu1 }
 0x1b9   :  { %v368_v39 = vadd.f32 %v476_v35, %v342_v38 }
 0x1ba   :  { %v373_v40 = vmax.f32 %v369_v37, 0.0 }
 0x1bb   :  { %v372_v41 = vmax.f32 %v368_v39, 0.0  ;;  %v536_v42 = vpop.f32.mrb[2].mxu1 }
 0x1bc   :  { %377 = vst.msk [vmem:[%s721_s7 + $0x8] sm:$0xff] %vm36_vm0, %v373_v40  ;;  %v371_v43 = vadd.f32 %v536_v42, %v476_v35  ;;  %v352_v44 = vpop.f32.mrb[3].mxu1 }
 0x1bd   :  { %376 = vst.msk [vmem:[%s721_s7] sm:$0xff] %vm36_vm0, %v372_v41  ;;  %v565_v45 = vpack.c.bf16 %v373_v40, %v372_v41  ;;  %v370_v46 = vadd.f32 %v476_v35, %v352_v44 }
 0x1be   :  { %v375_v47 = vmax.f32 %v371_v43, 0.0 }
 0x1bf   :  { %v374_v48 = vmax.f32 %v370_v46, 0.0  ;;  %566 = vmatpush3.bf16.msra.mxu0 %v565_v45 }
 0x1c0   :  { %379 = vst.msk [vmem:[%s721_s7 + $0x18] sm:$0xff] %vm36_vm0, %v375_v47  ;;  %567 = vmatprep.subr.bf16.mxu0 %v581_v33 }
 0x1c1   :  { %378 = vst.msk [vmem:[%s721_s7 + $0x10] sm:$0xff] %vm36_vm0, %v374_v48  ;;  %v568_v49 = vpack.c.bf16 %v375_v47, %v374_v48 }
 0x1c3   :  { %569 = vmatpush3.bf16.msra.mxu0 %v568_v49 }
 0x1c6   :  { %546 = vmatmul.mubr.msk.f32.vlgmr.msra.gmra.mrb[4].mxu0 %vm36_vm0, %v380_v50 }
 0x299   :  { %v450_v51 = vpop.f32.mrb[4].mxu0 }
 0x29a   :  { %455 = vst.msk [vmem:[%s723_s8] sm:$0x7] %vm454_vm3, %v450_v51  ;;  %v547_v52 = vpop.f32.mrb[5].mxu0 }

// kernel: net_forward.8
= control target key start
LH: loop header
LB: loop body
LE: loop exit
PB: predicated region body
PF: predicated region fallthrough
CT: control target
= control target key end

     0   :  { %vm50_vm0 = vcmask 1041408   ;;  %vm37_vm1 = vcmask 211968   ;;  %vm657_vm2 = vmmov 1   ;;  %v658_v8 = vmov 0   ;;  %s817_s0 = inlined_call_operand.vmem [shape: f32[26,26], index: 0, kind: input, shape index: {}]   ;;  %s818_s1 = inlined_call_operand.vmem [shape: f32[26,1], index: 1, kind: input, shape index: {}]   ;;  %s819_s2 = inlined_call_operand.vmem [shape: f32[26,32], index: 2, kind: input, shape index: {}]   ;;  %s820_s3 = inlined_call_operand.vmem [shape: f32[32,32], index: 3, kind: input, shape index: {}]   ;;  %s821_s4 = inlined_call_operand.vmem [shape: f32[32,32], index: 4, kind: input, shape index: {}]   ;;  %s822_s5 = inlined_call_operand.vmem [shape: f32[1,32], index: 5, kind: input, shape index: {}]   ;;  %s823_s6 = inlined_call_operand.vmem [shape: f32[3,26], index: 6, kind: input, shape index: {}]   ;;  %s824_s7 = inlined_call_operand.hbm [shape: f32[26,32], index: 7, kind: output, shape index: {0}]   ;;  %s825_s8 = inlined_call_operand.vmem [shape: f32[3,32], index: 8, kind: output, shape index: {1}]  }
   0x1   :  { %v33_v0 = vld [vmem:[%s819_s2] sm:$0xff]  ;;  %v34_v1 = vld [vmem:[%s819_s2 + $0x8] sm:$0xff]  ;;  %v35_v2 = vld [vmem:[%s819_s2 + $0x10] sm:$0xff]  ;;  %631 = vset.pattern.permute.xlu0 %v658_v8  ;;  %632 = vset.pattern.permute.xlu1 %v658_v8  ;;  %vm175_vm4 = vcmask 261120  }
   0x2   :  { %v586_v3 = vpack.c.bf16 %v34_v1, %v33_v0  ;;  %v36_v4 = vld [vmem:[%s819_s2 + $0x18] sm:$0x3]  ;;  %v29_v5 = vld [vmem:[%s817_s0] sm:$0xff]  ;;  %vm725_vm3 = vmpackc.low %vm50_vm0, %vm657_vm2  ;;  %555 = vmatprep.mubr.msk.f32.mxu1 %vm175_vm4, %v33_v0 }
   0x3   :  { %v590_v6 = vpack.c.bf16 %v36_v4, %v35_v2  ;;  %541 = vmatprep.mubr.msk.f32.mxu0 %vm37_vm1, %v29_v5  ;;  %v139_v9 = vld [vmem:[%s818_s1] sm:$0xff]  ;;  %v141_v10 = vld [vmem:[%s818_s1 + $0x10] sm:$0xff]  ;;  %v172_v12 = vld [vmem:[%s821_s4 + $0x8] sm:$0xff] }
   0x4   :  { %587 = vmatprep.subr.bf16.mxu0 %v586_v3  ;;  %145 = vperm.xlu0 %631, %v139_v9   ;;  %v171_v11 = vld [vmem:[%s821_s4] sm:$0xff]  ;;  %v140_v13 = vld [vmem:[%s818_s1 + $0x8] sm:$0xff]  ;;  %v173_v15 = vld [vmem:[%s821_s4 + $0x10] sm:$0xff] }
   0x5   :  { %589 = vmatpush3.bf16.msra.mxu0 %v586_v3  ;;  %155 = vperm.xlu1 %632, %v141_v10   ;;  %v596_v14 = vpack.c.bf16 %v172_v12, %v171_v11  ;;  %v174_v16 = vld [vmem:[%s821_s4 + $0x18] sm:$0xff] }
   0x6   :  { %592 = vmatprep.subr.msk.bf16.mxu0 %vm725_vm3, %v590_v6  ;;  %v142_v17 = vld [vmem:[%s818_s1 + $0x18] sm:$0x3]  ;;  %v600_v18 = vpack.c.bf16 %v174_v16, %v173_v15 }
   0x7   :  { %14 = vsyncpa [#allocation3], 0  ;;  %597 = vmatprep.subr.bf16.mxu1 %v596_v14  ;;  %v167_v19 = vld [vmem:[%s820_s3] sm:$0xff]  ;;  %v168_v20 = vld [vmem:[%s820_s3 + $0x8] sm:$0xff]  ;;  %v659_v40 = vmov 0.0|0.0   ;;  %vm660_vm5 = vmmov 0  }
   0x8   :  { %v30_v21 = vld [vmem:[%s817_s0 + $0x8] sm:$0xff]  ;;  %150 = vperm.xlu0 %631, %v140_v13   ;;  %v31_v22 = vld [vmem:[%s817_s0 + $0x10] sm:$0xff]  ;;  %599 = vmatpush3.bf16.msra.mxu1 %v596_v14  ;;  %v604_v23 = vpack.c.bf16 %v168_v20, %v167_v19  ;;  %v32_v24 = vld [vmem:[%s817_s0 + $0x18] sm:$0x3]  ;;  %v661_v41 = vmov 0.0   ;;  %vm387_vm6 = vcmask 254976  }
   0x9   :  { %595 = vmatpush3.bf16.msk.msra.mxu0 %vm725_vm3, %v590_v6  ;;  %160 = vperm.xlu1 %632, %v142_v17   ;;  %v169_v25 = vld [vmem:[%s820_s3 + $0x10] sm:$0xff]  ;;  %v170_v26 = vld [vmem:[%s820_s3 + $0x18] sm:$0xff]  ;;  %v501_v42 = vld [vmem:[%s822_s5] ss:$0 sm:$0xff]  ;;  %s662_s20 = smov [#allocation2]  }
   0xa   :  { %601 = vmatprep.subr.bf16.mxu1 %v600_v18  ;;  %v608_v27 = vpack.c.bf16 %v170_v26, %v169_v25  ;;  %612 = vmatprep.subr.bf16.mxu0 %v659_v40  ;;  %v389_v57 = vld [vmem:[%s823_s6] sm:$0x7]  ;;  %s473_s21 = sshll.u32 %s662_s20, 4  ;;  %s474_s21 = int_to_ptr.vmem [resolvable:$true] %s473_s21 }
   0xb   :  { %s633_s22 = scalar_lea.vmem %s474_s21, 512  ;;  %p638_p1 = scmp.lt.s32.totalorder %s474_s21, %s474_s21 }
   0xc   :  { %542 = vmatmul.mubr.msk.f32.vlgmr.msra.gmra.mrb[0].mxu0 %vm37_vm1, %v30_v21  ;;  %603 = vmatpush3.bf16.msra.mxu1 %v600_v18  ;;  %p634_p0 = scmp.ne.s32.totalorder %s474_s21, %s633_s22  ;;  %p639_p2 = scmp.lt.s32.totalorder %s633_s22, %s633_s22 }
   0xd   :  { %544 = vmatprep.mubr.msk.f32.mxu0 %vm37_vm1, %v31_v22  ;;  %605 = vmatprep.subr.bf16.mxu1 %v604_v23 }
   0xe   :  { %p640_p3 = por %p639_p2, %p638_p1 }
   0xf   :  { %556 = vmatmul.mubr.msk.f32.vlgmr.msra.gmra.mrb[0].mxu1 %vm175_vm4, %v34_v1 }
  0x10   :  { %545 = vmatmul.mubr.msk.f32.gmra.mrb[2].mxu0 %vm37_vm1, %v32_v24  ;;  %607 = vmatpush3.bf16.msra.mxu1 %v604_v23  ;;  %p641_p4 = pnand %p640_p3, %p634_p0 }
  0x11   :  { %558 = vmatprep.mubr.msk.f32.mxu1 %vm175_vm4, %v35_v2  ;;  %609 = vmatprep.subr.bf16.mxu1 %v608_v27 }
  0x12   :  { %583 = vmatprep.mubr.msk.f32.mxu0 %vm660_vm5, %v661_v41 }
  0x13   :  { %559 = vmatmul.mubr.msk.f32.gmra.mrb[2].mxu1 %vm175_vm4, %v36_v4 }
  0x14   :  { %611 = vmatpush3.bf16.msra.mxu1 %v608_v27 }
  0x83   :  { %v146_v28 = vpop.permute.xlu0 %145 }
  0x84   :  { %v156_v29 = vpop.permute.xlu1 %155 }
  0x87   :  { %v151_v32 = vpop.permute.xlu0 %150 }
  0x88   :  { %v161_v37 = vpop.permute.xlu1 %160 }
  0xdf   :  { %v543_v30 = vpop.f32.mrb[0].mxu0 }
  0xe0   :  { %v120_v31 = vpop.f32.mrb[1].mxu0  ;;  %v164_v34 = vmul.f32 %v543_v30, %v151_v32 }
  0xe1   :  { %v163_v33 = vmul.f32 %v146_v28, %v120_v31 }
  0xe3   :  { %v546_v35 = vpop.f32.mrb[2].mxu0  ;;  %569 = vmatprep.mubr.msk.f32.mxu1 %vm175_vm4, %v163_v33 }
  0xe4   :  { %v130_v36 = vpop.f32.mrb[3].mxu0  ;;  %570 = vmatmul.mubr.msk.f32.vlgmr.msra.gmra.mrb[0].mxu1 %vm175_vm4, %v164_v34  ;;  %v166_v39 = vmul.f32 %v546_v35, %v161_v37 }
  0xe5   :  { %v165_v38 = vmul.f32 %v156_v29, %v130_v36 }
  0xe7   :  { %572 = vmatprep.mubr.msk.f32.mxu1 %vm175_vm4, %v165_v38 }
  0xe8   :  { %573 = vmatmul.mubr.msk.f32.gmra.mrb[2].mxu1 %vm175_vm4, %v166_v39 }
 0x1b7   :  { %v571_v43 = vpop.f32.mrb[0].mxu1 }
 0x1b8   :  { %v377_v44 = vadd.f32 %v571_v43, %v501_v42  ;;  %v350_v45 = vpop.f32.mrb[1].mxu1 }
 0x1b9   :  { %v376_v46 = vadd.f32 %v501_v42, %v350_v45 }
 0x1ba   :  { %v381_v47 = vmax.f32 %v377_v44, 0.0 }
 0x1bb   :  { %v380_v48 = vmax.f32 %v376_v46, 0.0  ;;  %v574_v49 = vpop.f32.mrb[2].mxu1 }
 0x1bc   :  { %385 = vst.msk [vmem:[#allocation2 + $0x8] sm:$0xff] %vm175_vm4, %v381_v47  ;;  %v379_v50 = vadd.f32 %v574_v49, %v501_v42  ;;  %v360_v51 = vpop.f32.mrb[3].mxu1 }
 0x1bd   :  { %384 = vst.msk [vmem:[#allocation2] sm:$0xff] %vm175_vm4, %v380_v48  ;;  %v613_v52 = vpack.c.bf16 %v381_v47, %v380_v48  ;;  %v378_v53 = vadd.f32 %v501_v42, %v360_v51 }
 0x1be   :  { %v383_v54 = vmax.f32 %v379_v50, 0.0 }
 0x1bf   :  { %v382_v55 = vmax.f32 %v378_v53, 0.0  ;;  %614 = vmatpush3.bf16.msra.mxu0 %v613_v52 }
 0x1c0   :  { %388 = vst.msk [vmem:[#allocation2 + $0x18] sm:$0x3] %vm387_vm6, %v383_v54  ;;  %615 = vmatprep.subr.bf16.mxu0 %v659_v40 }
 0x1c1   :  { %386 = vst.msk [vmem:[#allocation2 + $0x10] sm:$0xff] %vm175_vm4, %v382_v55  ;;  %v616_v56 = vpack.c.bf16 %v383_v54, %v382_v55 }
 0x1c3   :  { %618 = vmatpush3.bf16.msk.msra.mxu0 %vm725_vm3, %v616_v56 }
 0x1c6   :  { %584 = vmatmul.mubr.msk.f32.vlgmr.msra.gmra.mrb[4].mxu0 %vm37_vm1, %v389_v57 }
 0x1c7   :  { %644 = shalt.err (!%p641_p4)
}
 0x1c8   :  { %s645_s25 = scalar_lea.hbm %s824_s7, 512 }
 0x1c9   :  { %p646_p5 = scmp.ne.s32.totalorder %s824_s7, %s645_s25  ;;  %p649_p6 = scmp.lt.u32.totalorder %s645_s25, %s824_s7 }
 0x1cb   :  { %p651_p7 = pnand %p649_p6, %p646_p5 }
 0x1cd   :  { %654 = shalt.err (!%p651_p7)
}
 0x1ce   :  { %s663_s29 = smov 128   ;;  %s664_s30 = smov 8   ;;  %vm466_vm7 = vcmask 256000  }
 0x1cf   :  { %479 = dma.vmem_to_hbm [thread:$0]  %s474_s21, 512, %s824_s7, [#allocation3], %s663_s29, %s663_s29, %s664_s30  }
 0x299   :  { %v462_v58 = vpop.f32.mrb[4].mxu0 }
 0x29a   :  { %467 = vst.msk [vmem:[%s825_s8] sm:$0x7] %vm466_vm7, %v462_v58  ;;  %v585_v59 = vpop.f32.mrb[5].mxu0 }
 0x29b   :  { %655 = dma.done.wait [#allocation3], 512  }
 0x29c   :  { %656 = vsyncadd [#allocation3], 4294966784 }
 0x29d   :  { %487 = vsyncpa [#allocation3], 1 }

// kernel: net_forward.7
= control target key start
LH: loop header
LB: loop body
LE: loop exit
PB: predicated region body
PF: predicated region fallthrough
CT: control target
= control target key end

     0   :  { %vm49_vm0 = vcmask 1041408   ;;  %vm36_vm1 = vcmask 211968   ;;  %v617_v3 = vmov 0   ;;  %vm618_vm2 = vmmov 1   ;;  %s775_s2 = inlined_call_operand.vmem [shape: f32[26,32], index: 2, kind: input, shape index: {}]   ;;  %s776_s0 = inlined_call_operand.vmem [shape: f32[26,26], index: 0, kind: input, shape index: {}]   ;;  %s777_s1 = inlined_call_operand.vmem [shape: f32[26,1], index: 1, kind: input, shape index: {}]   ;;  %s778_s4 = inlined_call_operand.vmem [shape: f32[32,32], index: 4, kind: input, shape index: {}]   ;;  %s779_s3 = inlined_call_operand.vmem [shape: f32[32,32], index: 3, kind: input, shape index: {}]   ;;  %s780_s5 = inlined_call_operand.vmem [shape: f32[1,32], index: 5, kind: input, shape index: {}]   ;;  %s781_s7 = inlined_call_operand.vmem [shape: f32[26,32], index: 7, kind: output, shape index: {0}]   ;;  %s782_s6 = inlined_call_operand.vmem [shape: f32[3,26], index: 6, kind: input, shape index: {}]   ;;  %s783_s8 = inlined_call_operand.vmem [shape: f32[3,32], index: 8, kind: output, shape index: {1}]  }
   0x1   :  { %v32_v0 = vld [vmem:[%s775_s2] sm:$0xff]  ;;  %v33_v1 = vld [vmem:[%s775_s2 + $0x8] sm:$0xff]  ;;  %v34_v2 = vld [vmem:[%s775_s2 + $0x10] sm:$0xff]  ;;  %615 = vset.pattern.permute.xlu0 %v617_v3  ;;  %616 = vset.pattern.permute.xlu1 %v617_v3  ;;  %vm174_vm4 = vcmask 261120   ;;  %v619_v40 = vmov 0.0|0.0   ;;  %vm620_vm5 = vmmov 0  }
   0x2   :  { %v573_v4 = vpack.c.bf16 %v33_v1, %v32_v0  ;;  %v35_v5 = vld [vmem:[%s775_s2 + $0x18] sm:$0x3]  ;;  %v28_v6 = vld [vmem:[%s776_s0] sm:$0xff]  ;;  %vm683_vm3 = vmpackc.low %vm49_vm0, %vm618_vm2  ;;  %542 = vmatprep.mubr.msk.f32.mxu1 %vm174_vm4, %v32_v0  ;;  %v621_v41 = vmov 0.0   ;;  %vm386_vm6 = vcmask 254976   ;;  %vm465_vm7 = vcmask 256000  }
   0x3   :  { %v577_v7 = vpack.c.bf16 %v35_v5, %v34_v2  ;;  %528 = vmatprep.mubr.msk.f32.mxu0 %vm36_vm1, %v28_v6  ;;  %v138_v9 = vld [vmem:[%s777_s1] sm:$0xff]  ;;  %v140_v10 = vld [vmem:[%s777_s1 + $0x10] sm:$0xff]  ;;  %v171_v12 = vld [vmem:[%s778_s4 + $0x8] sm:$0xff] }
   0x4   :  { %574 = vmatprep.subr.bf16.mxu0 %v573_v4  ;;  %144 = vperm.xlu0 %615, %v138_v9   ;;  %v170_v11 = vld [vmem:[%s778_s4] sm:$0xff]  ;;  %v139_v13 = vld [vmem:[%s777_s1 + $0x8] sm:$0xff]  ;;  %v172_v15 = vld [vmem:[%s778_s4 + $0x10] sm:$0xff] }
   0x5   :  { %576 = vmatpush3.bf16.msra.mxu0 %v573_v4  ;;  %154 = vperm.xlu1 %616, %v140_v10   ;;  %v583_v14 = vpack.c.bf16 %v171_v12, %v170_v11  ;;  %v173_v16 = vld [vmem:[%s778_s4 + $0x18] sm:$0xff]  ;;  %v166_v19 = vld [vmem:[%s779_s3] sm:$0xff]  ;;  %v167_v20 = vld [vmem:[%s779_s3 + $0x8] sm:$0xff] }
   0x6   :  { %579 = vmatprep.subr.msk.bf16.mxu0 %vm683_vm3, %v577_v7  ;;  %v141_v17 = vld [vmem:[%s777_s1 + $0x18] sm:$0x3]  ;;  %v587_v18 = vpack.c.bf16 %v173_v16, %v172_v15  ;;  %v29_v21 = vld [vmem:[%s776_s0 + $0x8] sm:$0xff]  ;;  %v30_v22 = vld [vmem:[%s776_s0 + $0x10] sm:$0xff]  ;;  %v591_v23 = vpack.c.bf16 %v167_v20, %v166_v19 }
   0x7   :  { %584 = vmatprep.subr.bf16.mxu1 %v583_v14  ;;  %v31_v24 = vld [vmem:[%s776_s0 + $0x18] sm:$0x3]  ;;  %v168_v25 = vld [vmem:[%s779_s3 + $0x10] sm:$0xff]  ;;  %v488_v42 = vld [vmem:[%s780_s5] ss:$0 sm:$0xff] }
   0x8   :  { %149 = vperm.xlu0 %615, %v139_v13   ;;  %586 = vmatpush3.bf16.msra.mxu1 %v583_v14  ;;  %v169_v26 = vld [vmem:[%s779_s3 + $0x18] sm:$0xff]  ;;  %v388_v57 = vld [vmem:[%s782_s6] sm:$0x7] }
   0x9   :  { %582 = vmatpush3.bf16.msk.msra.mxu0 %vm683_vm3, %v577_v7  ;;  %159 = vperm.xlu1 %616, %v141_v17   ;;  %v595_v27 = vpack.c.bf16 %v169_v26, %v168_v25 }
   0xa   :  { %588 = vmatprep.subr.bf16.mxu1 %v587_v18  ;;  %599 = vmatprep.subr.bf16.mxu0 %v619_v40 }
   0xc   :  { %529 = vmatmul.mubr.msk.f32.vlgmr.msra.gmra.mrb[0].mxu0 %vm36_vm1, %v29_v21  ;;  %590 = vmatpush3.bf16.msra.mxu1 %v587_v18 }
   0xd   :  { %531 = vmatprep.mubr.msk.f32.mxu0 %vm36_vm1, %v30_v22  ;;  %592 = vmatprep.subr.bf16.mxu1 %v591_v23 }
   0xf   :  { %543 = vmatmul.mubr.msk.f32.vlgmr.msra.gmra.mrb[0].mxu1 %vm174_vm4, %v33_v1 }
  0x10   :  { %532 = vmatmul.mubr.msk.f32.gmra.mrb[2].mxu0 %vm36_vm1, %v31_v24  ;;  %594 = vmatpush3.bf16.msra.mxu1 %v591_v23 }
  0x11   :  { %545 = vmatprep.mubr.msk.f32.mxu1 %vm174_vm4, %v34_v2  ;;  %596 = vmatprep.subr.bf16.mxu1 %v595_v27 }
  0x12   :  { %570 = vmatprep.mubr.msk.f32.mxu0 %vm620_vm5, %v621_v41 }
  0x13   :  { %546 = vmatmul.mubr.msk.f32.gmra.mrb[2].mxu1 %vm174_vm4, %v35_v5 }
  0x14   :  { %598 = vmatpush3.bf16.msra.mxu1 %v595_v27 }
  0x83   :  { %v145_v28 = vpop.permute.xlu0 %144 }
  0x84   :  { %v155_v29 = vpop.permute.xlu1 %154 }
  0x87   :  { %v150_v32 = vpop.permute.xlu0 %149 }
  0x88   :  { %v160_v37 = vpop.permute.xlu1 %159 }
  0xdf   :  { %v530_v30 = vpop.f32.mrb[0].mxu0 }
  0xe0   :  { %v119_v31 = vpop.f32.mrb[1].mxu0  ;;  %v163_v34 = vmul.f32 %v530_v30, %v150_v32 }
  0xe1   :  { %v162_v33 = vmul.f32 %v145_v28, %v119_v31 }
  0xe3   :  { %v533_v35 = vpop.f32.mrb[2].mxu0  ;;  %556 = vmatprep.mubr.msk.f32.mxu1 %vm174_vm4, %v162_v33 }
  0xe4   :  { %v129_v36 = vpop.f32.mrb[3].mxu0  ;;  %557 = vmatmul.mubr.msk.f32.vlgmr.msra.gmra.mrb[0].mxu1 %vm174_vm4, %v163_v34  ;;  %v165_v39 = vmul.f32 %v533_v35, %v160_v37 }
  0xe5   :  { %v164_v38 = vmul.f32 %v155_v29, %v129_v36 }
  0xe7   :  { %559 = vmatprep.mubr.msk.f32.mxu1 %vm174_vm4, %v164_v38 }
  0xe8   :  { %560 = vmatmul.mubr.msk.f32.gmra.mrb[2].mxu1 %vm174_vm4, %v165_v39 }
 0x1b7   :  { %v558_v43 = vpop.f32.mrb[0].mxu1 }
 0x1b8   :  { %v376_v44 = vadd.f32 %v558_v43, %v488_v42  ;;  %v349_v45 = vpop.f32.mrb[1].mxu1 }
 0x1b9   :  { %v375_v46 = vadd.f32 %v488_v42, %v349_v45 }
 0x1ba   :  { %v380_v47 = vmax.f32 %v376_v44, 0.0 }
 0x1bb   :  { %v379_v48 = vmax.f32 %v375_v46, 0.0  ;;  %v561_v49 = vpop.f32.mrb[2].mxu1 }
 0x1bc   :  { %384 = vst.msk [vmem:[%s781_s7 + $0x8] sm:$0xff] %vm174_vm4, %v380_v47  ;;  %v378_v50 = vadd.f32 %v561_v49, %v488_v42  ;;  %v359_v51 = vpop.f32.mrb[3].mxu1 }
 0x1bd   :  { %383 = vst.msk [vmem:[%s781_s7] sm:$0xff] %vm174_vm4, %v379_v48  ;;  %v600_v52 = vpack.c.bf16 %v380_v47, %v379_v48  ;;  %v377_v53 = vadd.f32 %v488_v42, %v359_v51 }
 0x1be   :  { %v382_v54 = vmax.f32 %v378_v50, 0.0 }
 0x1bf   :  { %v381_v55 = vmax.f32 %v377_v53, 0.0  ;;  %601 = vmatpush3.bf16.msra.mxu0 %v600_v52 }
 0x1c0   :  { %387 = vst.msk [vmem:[%s781_s7 + $0x18] sm:$0x3] %vm386_vm6, %v382_v54  ;;  %602 = vmatprep.subr.bf16.mxu0 %v619_v40 }
 0x1c1   :  { %385 = vst.msk [vmem:[%s781_s7 + $0x10] sm:$0xff] %vm174_vm4, %v381_v55  ;;  %v603_v56 = vpack.c.bf16 %v382_v54, %v381_v55 }
 0x1c3   :  { %605 = vmatpush3.bf16.msk.msra.mxu0 %vm683_vm3, %v603_v56 }
 0x1c6   :  { %571 = vmatmul.mubr.msk.f32.vlgmr.msra.gmra.mrb[4].mxu0 %vm36_vm1, %v388_v57 }
 0x299   :  { %v461_v58 = vpop.f32.mrb[4].mxu0 }
 0x29a   :  { %466 = vst.msk [vmem:[%s783_s8] sm:$0x7] %vm465_vm7, %v461_v58  ;;  %v572_v59 = vpop.f32.mrb[5].mxu0 }

// kernel: net_forward.9
= control target key start
LH: loop header
LB: loop body
LE: loop exit
PB: predicated region body
PF: predicated region fallthrough
CT: control target
= control target key end

     0   :  { %v624_v3 = vmov 0.0|0.0   ;;  %vm625_vm0 = vmmov 0   ;;  %v626_v11 = vmov 0.0   ;;  %s791_s0 = inlined_call_operand.vmem [shape: f32[3,32], index: 0, kind: input, shape index: {}]   ;;  %s792_s1 = inlined_call_operand.vmem [shape: f32[3,32], index: 1, kind: input, shape index: {}]   ;;  %s793_s2 = inlined_call_operand.vmem [shape: f32[3,32], index: 2, kind: input, shape index: {}]   ;;  %s794_s3 = inlined_call_operand.vmem [shape: f32[3,32], index: 3, kind: input, shape index: {}]   ;;  %s795_s4 = inlined_call_operand.vmem [shape: f32[32,32], index: 4, kind: input, shape index: {}]   ;;  %s796_s5 = inlined_call_operand.vmem [shape: f32[32,32], index: 5, kind: input, shape index: {}]   ;;  %s797_s6 = inlined_call_operand.vmem [shape: f32[32,32], index: 6, kind: input, shape index: {}]   ;;  %s798_s7 = inlined_call_operand.vmem [shape: f32[32,32], index: 7, kind: input, shape index: {}]   ;;  %s799_s8 = inlined_call_operand.vmem [shape: f32[1,32], index: 8, kind: input, shape index: {}]   ;;  %s800_s9 = inlined_call_operand.vmem [shape: f32[32,6], index: 9, kind: input, shape index: {}]   ;;  %s801_s10 = inlined_call_operand.vmem [shape: f32[1,6], index: 10, kind: input, shape index: {}]   ;;  %s802_s11 = inlined_call_operand.hbm [shape: f32[3,6], index: 11, kind: output, shape index: {}]  }
   0x1   :  { %v45_v0 = vld [vmem:[%s796_s5] sm:$0xff]  ;;  %v46_v1 = vld [vmem:[%s796_s5 + $0x8] sm:$0xff]  ;;  %562 = vmatprep.subr.bf16.mxu0 %v624_v3  ;;  %568 = vmatprep.subr.bf16.mxu1 %v624_v3  ;;  %v47_v6 = vld [vmem:[%s796_s5 + $0x10] sm:$0xff] }
   0x2   :  { %v40_v2 = vld [vmem:[%s795_s4] sm:$0xff]  ;;  %v563_v4 = vpack.c.bf16 %v46_v1, %v45_v0  ;;  %v41_v5 = vld [vmem:[%s795_s4 + $0x8] sm:$0xff]  ;;  %v48_v7 = vld [vmem:[%s796_s5 + $0x18] sm:$0xff]  ;;  %515 = vmatprep.mubr.msk.f32.mxu0 %vm625_vm0, %v626_v11  ;;  %526 = vmatprep.mubr.msk.f32.mxu1 %vm625_vm0, %v626_v11 }
   0x3   :  { %v569_v8 = vpack.c.bf16 %v41_v5, %v40_v2  ;;  %v42_v9 = vld [vmem:[%s795_s4 + $0x10] sm:$0xff]  ;;  %v43_v10 = vld [vmem:[%s795_s4 + $0x18] sm:$0xff]  ;;  %v566_v12 = vpack.c.bf16 %v48_v7, %v47_v6  ;;  %v197_v14 = vld [vmem:[%s797_s6] sm:$0xff] }
   0x4   :  { %564 = vmatpush3.bf16.msra.mxu0 %v563_v4  ;;  %v572_v13 = vpack.c.bf16 %v43_v10, %v42_v9  ;;  %v198_v15 = vld [vmem:[%s797_s6 + $0x8] sm:$0xff]  ;;  %v276_v16 = vld [vmem:[%s798_s7] sm:$0xff] }
   0x5   :  { %570 = vmatpush3.bf16.msra.mxu1 %v569_v8  ;;  %565 = vmatprep.subr.bf16.mxu0 %v624_v3  ;;  %v277_v17 = vld [vmem:[%s798_s7 + $0x8] sm:$0xff] }
   0x6   :  { %571 = vmatprep.subr.bf16.mxu1 %v624_v3 }
   0x7   :  { %16 = vsyncpa [#allocation3], 0  ;;  %v44_v18 = vld [vmem:[%s792_s1] sm:$0x7]  ;;  %vm49_vm1 = vcmask 261120   ;;  %v575_v19 = vpack.c.bf16 %v198_v15, %v197_v14  ;;  %v581_v21 = vpack.c.bf16 %v277_v17, %v276_v16  ;;  %v199_v22 = vld [vmem:[%s797_s6 + $0x10] sm:$0xff] }
   0x8   :  { %567 = vmatpush3.bf16.msra.mxu0 %v566_v12  ;;  %v39_v20 = vld [vmem:[%s791_s0] sm:$0x7]  ;;  %v200_v23 = vld [vmem:[%s797_s6 + $0x18] sm:$0xff]  ;;  %v278_v24 = vld [vmem:[%s798_s7 + $0x10] sm:$0xff]  ;;  %vm447_vm2 = vcmask 43008  }
   0x9   :  { %573 = vmatpush3.bf16.msra.mxu1 %v572_v13  ;;  %574 = vmatprep.subr.bf16.mxu0 %v624_v3  ;;  %v279_v25 = vld [vmem:[%s798_s7 + $0x18] sm:$0xff]  ;;  %v578_v26 = vpack.c.bf16 %v200_v23, %v199_v22  ;;  %v196_v28 = vld [vmem:[%s793_s2] sm:$0x7]  ;;  %v364_v31 = vld [vmem:[%s800_s9 + $0x8] sm:$0xff] }
   0xa   :  { %580 = vmatprep.subr.bf16.mxu1 %v624_v3  ;;  %v584_v27 = vpack.c.bf16 %v279_v25, %v278_v24  ;;  %v275_v29 = vld [vmem:[%s794_s3] sm:$0x7]  ;;  %v365_v33 = vld [vmem:[%s800_s9 + $0x10] sm:$0xff]  ;;  %v366_v34 = vld [vmem:[%s800_s9 + $0x18] sm:$0xff] }
   0xb   :  { %516 = vmatmul.mubr.msk.f32.vlgmr.msra.gmra.mrb[0].mxu0 %vm49_vm1, %v44_v18  ;;  %v363_v30 = vld [vmem:[%s800_s9] sm:$0xff]  ;;  %v590_v35 = vpack.c.bf16 %v366_v34, %v365_v33 }
   0xc   :  { %527 = vmatmul.mubr.msk.f32.vlgmr.msra.gmra.mrb[0].mxu1 %vm49_vm1, %v39_v20  ;;  %576 = vmatpush3.bf16.msra.mxu0 %v575_v19  ;;  %v587_v32 = vpack.c.bf16 %v364_v31, %v363_v30  ;;  %v479_v45 = vld [vmem:[%s799_s8] ss:$0 sm:$0xff]  ;;  %s627_s8 = smov [#allocation2]  }
   0xd   :  { %582 = vmatpush3.bf16.msra.mxu1 %v581_v21  ;;  %577 = vmatprep.subr.bf16.mxu0 %v624_v3  ;;  %v480_v50 = vld [vmem:[%s801_s10] ss:$0 sm:$0xff]  ;;  %s467_s10 = sshll.u32 %s627_s8, 4  ;;  %s468_s10 = int_to_ptr.vmem [resolvable:$true] %s467_s10 }
   0xe   :  { %583 = vmatprep.subr.bf16.mxu1 %v624_v3  ;;  %537 = vmatprep.mubr.msk.f32.mxu0 %vm625_vm0, %v626_v11  ;;  %s600_s20 = scalar_lea.vmem %s468_s10, 64  ;;  %p605_p1 = scmp.lt.s32.totalorder %s468_s10, %s468_s10 }
   0xf   :  { %548 = vmatprep.mubr.msk.f32.mxu1 %vm625_vm0, %v626_v11  ;;  %p601_p0 = scmp.ne.s32.totalorder %s468_s10, %s600_s20  ;;  %p606_p2 = scmp.lt.s32.totalorder %s600_s20, %s600_s20 }
  0x10   :  { %579 = vmatpush3.bf16.msra.mxu0 %v578_v26 }
  0x11   :  { %585 = vmatpush3.bf16.msra.mxu1 %v584_v27  ;;  %586 = vmatprep.subr.bf16.mxu0 %v624_v3  ;;  %p607_p3 = por %p606_p2, %p605_p1 }
  0x13   :  { %538 = vmatmul.mubr.msk.f32.vlgmr.msra.gmra.mrb[2].mxu0 %vm49_vm1, %v196_v28  ;;  %p608_p4 = pnand %p607_p3, %p601_p0 }
  0x14   :  { %549 = vmatmul.mubr.msk.f32.vlgmr.msra.gmra.mrb[2].mxu1 %vm49_vm1, %v275_v29  ;;  %559 = vmatprep.mubr.msk.f32.mxu0 %vm625_vm0, %v626_v11 }
  0x15   :  { %588 = vmatpush3.bf16.msra.mxu0 %v587_v32 }
  0x16   :  { %589 = vmatprep.subr.bf16.mxu0 %v624_v3 }
  0x19   :  { %591 = vmatpush3.bf16.msra.mxu0 %v590_v35 }
  0xde   :  { %v119_v36 = vpop.f32.mrb[0].mxu0 }
  0xdf   :  { %v517_v37 = vpop.f32.mrb[1].mxu0  ;;  %v192_v38 = vpop.f32.mrb[0].mxu1 }
  0xe0   :  { %v193_v39 = vadd.f32 %v192_v38, %v119_v36  ;;  %v528_v40 = vpop.f32.mrb[1].mxu1 }
  0xe6   :  { %v270_v41 = vpop.f32.mrb[2].mxu0 }
  0xe7   :  { %v274_v42 = vadd.f32 %v270_v41, %v193_v39  ;;  %v539_v43 = vpop.f32.mrb[3].mxu0  ;;  %v349_v44 = vpop.f32.mrb[2].mxu1 }
  0xe8   :  { %v550_v46 = vpop.f32.mrb[3].mxu1 }
  0xe9   :  { %v353_v47 = vadd.f32 %v349_v44, %v274_v42 }
  0xeb   :  { %v361_v48 = vadd.f32 %v479_v45, %v353_v47 }
  0xed   :  { %v362_v49 = vmax.f32 %v361_v48, 0.0 }
  0xef   :  { %560 = vmatmul.mubr.msk.f32.vlgmr.msra.gmra.mrb[4].mxu0 %vm49_vm1, %v362_v49 }
 0x1c2   :  { %v443_v51 = vpop.f32.mrb[4].mxu0 }
 0x1c3   :  { %v444_v52 = vadd.f32 %v480_v50, %v443_v51  ;;  %v561_v53 = vpop.f32.mrb[5].mxu0 }
 0x1c5   :  { %v448_v54 = vsel %vm447_vm2, %v444_v52, -inf }
 0x1c6   :  { %449 = vmax.xlane.f32.xlu0 %v448_v54 }
 0x253   :  { %v450_v55 = vpop.xlane.xlu0 %449 }
 0x254   :  { %v451_v56 = vsub.f32 %v444_v52, %v450_v55 }
 0x256   :  { %v452_v57 = vmul.f32 1.442695, %v451_v56 }
 0x258   :  { %596 = vpow2.f32 %v452_v57 }
 0x262   :  { %v597_v58 = vpop.eup %596 }
 0x263   :  { %v454_v59 = vsel %vm447_vm2, %v597_v58, 0.0 }
 0x264   :  { %455 = vadd.xlane.f32.xlu0 %v454_v59 }
 0x2f1   :  { %v456_v60 = vpop.xlane.xlu0 %455 }
 0x2f2   :  { %598 = vlog2.f32 %v456_v60 }
 0x2fc   :  { %v599_v61 = vpop.eup %598 }
 0x2fd   :  { %v458_v62 = vmul.f32 0.6931472, %v599_v61 }
 0x2ff   :  { %v459_v63 = vsub.f32 %v451_v56, %v458_v62 }
 0x301   :  { %460 = vst.msk [vmem:[#allocation2] sm:$0x7] %vm447_vm2, %v459_v63 }
 0x302   :  { %611 = shalt.err (!%p608_p4)
}
 0x303   :  { %s612_s23 = scalar_lea.hbm %s802_s11, 64 }
 0x304   :  { %p613_p5 = scmp.ne.s32.totalorder %s802_s11, %s612_s23  ;;  %p616_p6 = scmp.lt.u32.totalorder %s612_s23, %s802_s11 }
 0x306   :  { %p618_p7 = pnand %p616_p6, %p613_p5 }
 0x308   :  { %621 = shalt.err (!%p618_p7)
}
 0x309   :  { %470 = dma.vmem_to_hbm [thread:$0]  %s468_s10, 64, %s802_s11, [#allocation3]  }
 0x30a   :  { %622 = dma.done.wait [#allocation3], 64  }
 0x30b   :  { %623 = vsyncadd [#allocation3], 4294967232 }
 0x30c   :  { %474 = vsyncpa [#allocation3], 1 }

</bundles_post_ra>
